<compile_context>
chip_gen: v6e
topology: v6e:2x2x1
jax: 0.10.0
libtpu: 0.0.40
codegen_flags: <defaults>
</compile_context>

<pallas_src>
import functools

import jax
import jax.numpy as jnp
from jax import lax
from jax.experimental import pallas as pl
from jax.experimental.pallas import tpu as pltpu


def _layernorm(x, gamma, beta, eps=1e-5):
    # one-pass: var = E[x^2] - mu^2  (halves the cross-lane reductions)
    mu = jnp.mean(x, axis=-1, keepdims=True)
    ms = jnp.mean(x * x, axis=-1, keepdims=True)
    var = ms - mu * mu
    return (x - mu) * lax.rsqrt(var + eps) * gamma + beta


def _silu(x):
    # exp on the EUP, approx reciprocal keeps the divide off the VALU
    return x * pl.reciprocal(1.0 + jnp.exp(-x), approx=True)


def _equivariant_update_kernel(
    z1_ref,       # [TE, H]   pre-activation of coord_mlp layer 1 (x@W1 + b1), f32
    cdiffT_ref,   # [8, TE]   coord_diff^T (rows 0..2 real, rest zero), f32
    emask_ref,    # [TE, 1]   edge mask, f32
    row_ref,      # [TE, 1]   int32 destination node per edge
    coordT_ref,   # [8, Np]   coord^T (rows 0..2 real), f32        (grid-constant)
    nmaskT_ref,   # [1, Np]   node mask, f32                        (grid-constant)
    cntT_ref,     # [1, Np]   per-node divisor (norm factor / counts)
    g1_ref, be1_ref,          # [1, H] LayerNorm 1
    w2_ref,                   # [H, H] bf16
    b2_ref, g2_ref, be2_ref,  # [1, H]
    w3_ref,                   # [1, H] final Linear(H, 1) weight as a row
    out_ref,      # [8, Np]   (coord + agg) * node_mask, transposed layout
    agg_ref,      # [8, Np]   f32 VMEM scratch accumulator
    *,
    use_tanh: bool,
    coords_range: float,
):
    t = pl.program_id(0)

    @pl.when(t == 0)
    def _():
        agg_ref[...] = jnp.zeros_like(agg_ref)

    # ---- coord MLP (layer-1 matmul hoisted to the wrapper) ----
    h1 = _silu(_layernorm(z1_ref[...], g1_ref[...], be1_ref[...]))
    h2 = jnp.dot(h1.astype(jnp.bfloat16), w2_ref[...],
                 preferred_element_type=jnp.float32) + b2_ref[...]
    h2 = _silu(_layernorm(h2, g2_ref[...], be2_ref[...]))

    # Linear(H, 1, bias=False): VPU multiply + XLU lane reduce (skip 1-col MXU matmul)
    m = jnp.sum(h2 * w3_ref[...], axis=-1, keepdims=True)        # [TE, 1]
    if use_tanh:
        m = jnp.tanh(m) * coords_range
    w = m * emask_ref[...]                                        # [TE, 1]

    # ---- lane-dense scatter: agg^T[3, N] += cdiff^T[3, TE] @ (m*mask)*onehot[TE, N]
    TE = z1_ref.shape[0]
    Np = out_ref.shape[-1]
    node_iota = lax.broadcasted_iota(jnp.int32, (TE, Np), 1)
    weighted = jnp.where(node_iota == row_ref[...], w, 0.0)       # [TE, Np] f32
    agg_ref[...] += jnp.dot(cdiffT_ref[...], weighted,
                            preferred_element_type=jnp.float32)   # [8, Np]

    @pl.when(t == pl.num_programs(0) - 1)
    def _():
        agg = agg_ref[...] / cntT_ref[...]
        out_ref[...] = (coordT_ref[...] + agg) * nmaskT_ref[...]


def equivariant_update_forward(
    h, coord, edge_index, coord_diff, edge_attr, node_mask, edge_mask, params, *,
    normalization_factor=100.0, aggregation_method="sum",
    tanh=False, coords_range=10.0, edge_tile=128,
):
    assert aggregation_method in ("sum", "mean"), (
        f"unsupported aggregation_method: {aggregation_method}")

    row, col = edge_index
    row = row.astype(jnp.int32)
    col = col.astype(jnp.int32)
    N, H = h.shape
    E = row.shape[0]

    # ---- hoist the per-node halves of matmul 1 (E >> N win); gather is glue ----
    w1 = params["w1"].astype(jnp.float32)
    w1_row, w1_col, w1_attr = w1[:H], w1[H:2 * H], w1[2 * H:]
    p = h.astype(jnp.float32) @ w1_row                       # [N, H]
    q = h.astype(jnp.float32) @ w1_col                       # [N, H]
    z1 = p[row] + q[col] + edge_attr.astype(jnp.float32) @ w1_attr + params["b1"]

    # ---- padding: edges to a tile multiple, nodes to the 128-lane axis ----
    TE = int(edge_tile)
    E_pad = ((E + TE - 1) // TE) * TE
    Np = ((N + 127) // 128) * 128

    def pad_rows(a, rows):
        return jnp.pad(a, ((0, rows - a.shape[0]), (0, 0)))

    z1p = pad_rows(z1, E_pad)                                            # [E_pad, H]
    cdiffT = jnp.zeros((8, E_pad), jnp.float32).at[:3, :E].set(
        coord_diff.astype(jnp.float32).T)                                # [8, E_pad]
    emaskp = pad_rows(edge_mask.astype(jnp.float32), E_pad)              # [E_pad, 1]
    rowp = pad_rows(row[:, None], E_pad)                                 # [E_pad, 1]
    coordT = jnp.zeros((8, Np), jnp.float32).at[:3, :N].set(
        coord.astype(jnp.float32).T)                                     # [8, Np]
    nmaskT = jnp.zeros((1, Np), jnp.float32).at[:, :N].set(
        node_mask.astype(jnp.float32).T)                                 # [1, Np]

    # per-node divisor: normalization_factor for 'sum', segment counts for 'mean'
    if aggregation_method == "mean":
        cnt = jax.ops.segment_sum(jnp.ones((E,), jnp.float32), row, num_segments=N)
        cnt = jnp.where(cnt == 0, 1.0, cnt)
    else:
        cnt = jnp.full((N,), float(normalization_factor), jnp.float32)
    cntT = jnp.ones((1, Np), jnp.float32).at[:, :N].set(cnt[None, :])

    g1 = params["g1"].astype(jnp.float32)
    be1 = params["be1"].astype(jnp.float32)
    w2 = params["w2"].astype(jnp.bfloat16)
    b2 = params["b2"].astype(jnp.float32)
    g2 = params["g2"].astype(jnp.float32)
    be2 = params["be2"].astype(jnp.float32)
    w3 = params["w3"].astype(jnp.float32).T                              # [1, H]

    inputs = [z1p, cdiffT, emaskp, rowp, coordT, nmaskT, cntT,
              g1, be1, w2, b2, g2, be2, w3]

    def const_spec(shape):
        return pl.BlockSpec(shape, lambda i: (0,) * len(shape))

    in_specs = [
        pl.BlockSpec((TE, H), lambda i: (i, 0)),   # z1 tile
        pl.BlockSpec((8, TE), lambda i: (0, i)),   # coord_diff^T tile
        pl.BlockSpec((TE, 1), lambda i: (i, 0)),   # edge mask tile
        pl.BlockSpec((TE, 1), lambda i: (i, 0)),   # row tile
        const_spec((8, Np)),                       # coord^T
        const_spec((1, Np)),                       # node mask^T
        const_spec((1, Np)),                       # divisor
        const_spec((1, H)), const_spec((1, H)),    # g1, be1
        const_spec((H, H)),                        # w2 (bf16)
        const_spec((1, H)), const_spec((1, H)), const_spec((1, H)),  # b2, g2, be2
        const_spec((1, H)),                        # w3 row
    ]

    kernel = functools.partial(
        _equivariant_update_kernel,
        use_tanh=bool(tanh),
        coords_range=float(coords_range),
    )

    outT = pl.pallas_call(
        kernel,
        out_shape=jax.ShapeDtypeStruct((8, Np), jnp.float32),
        grid=(E_pad // TE,),
        in_specs=in_specs,
        out_specs=pl.BlockSpec((8, Np), lambda i: (0, 0)),
        scratch_shapes=[pltpu.VMEM((8, Np), jnp.float32)],
        compiler_params=pltpu.CompilerParams(
            dimension_semantics=("arbitrary",),          # edge axis is a reduction
            vmem_limit_bytes=32 * 1024 * 1024,           # safe on v5e/v6e/v7x
        ),
    )(*inputs)

    return outT[:3, :N].T                                                 # [N, 3]


# -------------------- pure-JAX reference (matches the PyTorch module) -----------
def reference_forward(h, coord, edge_index, coord_diff, edge_attr, node_mask,
                      edge_mask, params, *, normalization_factor, aggregation_method,
                      tanh, coords_range):
    row, col = edge_index

    def ln(x, g, b, eps=1e-5):
        mu = jnp.mean(x, -1, keepdims=True)
        var = jnp.mean((x - mu) ** 2, -1, keepdims=True)
        return (x - mu) / jnp.sqrt(var + eps) * g + b

    def silu(x):
        return x * jax.nn.sigmoid(x)

    x = jnp.concatenate([h[row], h[col], edge_attr], axis=1)
    h1 = silu(ln(x @ params["w1"] + params["b1"], params["g1"], params["be1"]))
    h2 = silu(ln(h1 @ params["w2"] + params["b2"], params["g2"], params["be2"]))
    m = h2 @ params["w3"]
    if tanh:
        m = jnp.tanh(m) * coords_range
    trans = coord_diff * m * edge_mask
    agg = jax.ops.segment_sum(trans, row, num_segments=coord.shape[0])
    if aggregation_method == "sum":
        agg = agg / normalization_factor
    elif aggregation_method == "mean":
        cnt = jax.ops.segment_sum(jnp.ones_like(trans), row, num_segments=coord.shape[0])
        cnt = jnp.where(cnt == 0, 1.0, cnt)
        agg = agg / cnt
    return (coord + agg) * node_mask


def init_params(key, hidden_nf, edges_in_d):
    input_edge = hidden_nf * 2 + edges_in_d
    k1, k2, k3, k4, k5 = jax.random.split(key, 5)

    def xavier(k, fan_in, fan_out, gain=1.0):
        bound = gain * jnp.sqrt(6.0 / (fan_in + fan_out))
        return jax.random.uniform(k, (fan_in, fan_out), jnp.float32, -bound, bound)

    return {
        "w1": xavier(k1, input_edge, hidden_nf),
        "b1": jax.random.normal(k2, (1, hidden_nf), jnp.float32) * 0.01,
        "g1": jnp.ones((1, hidden_nf), jnp.float32),
        "be1": jnp.zeros((1, hidden_nf), jnp.float32),
        "w2": xavier(k3, hidden_nf, hidden_nf),
        "b2": jax.random.normal(k4, (1, hidden_nf), jnp.float32) * 0.01,
        "g2": jnp.ones((1, hidden_nf), jnp.float32),
        "be2": jnp.zeros((1, hidden_nf), jnp.float32),
        # final layer: Linear(hidden, 1, bias=False), xavier_uniform gain=0.001
        "w3": xavier(k5, hidden_nf, 1, gain=0.001),
    }


if __name__ == "__main__":
    key = jax.random.PRNGKey(0)
    N, hidden_nf, edges_in_d = 8, 32, 1
    normalization_factor = 100.0
    aggregation_method = "sum"
    use_tanh = False
    coords_range = 10.0

    # fully connected edges (incl. self loops) -> E = N*N = 64
    rows = jnp.repeat(jnp.arange(N, dtype=jnp.int32), N)
    cols = jnp.tile(jnp.arange(N, dtype=jnp.int32), N)
    E = rows.shape[0]

    kh, kc, kd, ka, km, kn, kp = jax.random.split(key, 7)
    h = jax.random.normal(kh, (N, hidden_nf), jnp.float32)
    coord = jax.random.normal(kc, (N, 3), jnp.float32)
    coord_diff = jax.random.normal(kd, (E, 3), jnp.float32)
    edge_attr = jax.random.normal(ka, (E, edges_in_d), jnp.float32)
    edge_mask = (jax.random.uniform(km, (E, 1)) > 0.2).astype(jnp.float32)
    node_mask = (jax.random.uniform(kn, (N, 1)) > 0.1).astype(jnp.float32)
    params = init_params(kp, hidden_nf, edges_in_d)

    out = equivariant_update_forward(
        h, coord, (rows, cols), coord_diff, edge_attr, node_mask, edge_mask, params,
        normalization_factor=normalization_factor,
        aggregation_method=aggregation_method,
        tanh=use_tanh, coords_range=coords_range,
    )
    out = jax.block_until_ready(out)

    ref = reference_forward(
        h, coord, (rows, cols), coord_diff, edge_attr, node_mask, edge_mask, params,
        normalization_factor=normalization_factor,
        aggregation_method=aggregation_method,
        tanh=use_tanh, coords_range=coords_range,
    )
    err = jnp.max(jnp.abs(out - ref))
    # bf16 MXU matmul + approx reciprocal in SiLU => slightly looser tolerance than pure f32
    assert jnp.allclose(out, ref, rtol=1e-2, atol=1e-3), f"max abs err {err}"

    print("KERNEL_OK")
</pallas_src>

<mosaic_0001>
module attributes {stable_mosaic.version = 11 : i64} {
  func.func @_equivariant_update_kernel(%arg0: i32, %arg1: memref<128x32xf32, #tpu.memory_space<vmem>>, %arg2: memref<8x128xf32, #tpu.memory_space<vmem>>, %arg3: memref<128x1xf32, #tpu.memory_space<vmem>>, %arg4: memref<128x1xi32, #tpu.memory_space<vmem>>, %arg5: memref<8x128xf32, #tpu.memory_space<vmem>>, %arg6: memref<1x128xf32, #tpu.memory_space<vmem>>, %arg7: memref<1x128xf32, #tpu.memory_space<vmem>>, %arg8: memref<1x32xf32, #tpu.memory_space<vmem>>, %arg9: memref<1x32xf32, #tpu.memory_space<vmem>>, %arg10: memref<32x32xbf16, #tpu.memory_space<vmem>>, %arg11: memref<1x32xf32, #tpu.memory_space<vmem>>, %arg12: memref<1x32xf32, #tpu.memory_space<vmem>>, %arg13: memref<1x32xf32, #tpu.memory_space<vmem>>, %arg14: memref<1x32xf32, #tpu.memory_space<vmem>>, %arg15: memref<8x128xf32, #tpu.memory_space<vmem>>, %arg16: memref<8x128xf32, #tpu.memory_space<vmem>>) attributes {dimension_semantics = [#tpu.dimension_semantics<arbitrary>], iteration_bounds = array<i64: 1>, scalar_prefetch = 0 : i64, scratch_operands = 1 : i64, tpu.core_type = #tpu.core_type<tc>, window_params = [{transform_indices = @transform_0, window_bounds = array<i64: 128, 32>}, {transform_indices = @transform_1, window_bounds = array<i64: 8, 128>}, {transform_indices = @transform_2, window_bounds = array<i64: 128, 1>}, {transform_indices = @transform_3, window_bounds = array<i64: 128, 1>}, {pipeline_mode = #tpu.pipeline_mode<synchronous>, transform_indices = @transform_4, window_bounds = array<i64: 8, 128>}, {pipeline_mode = #tpu.pipeline_mode<synchronous>, transform_indices = @transform_5, window_bounds = array<i64: 1, 128>}, {pipeline_mode = #tpu.pipeline_mode<synchronous>, transform_indices = @transform_6, window_bounds = array<i64: 1, 128>}, {pipeline_mode = #tpu.pipeline_mode<synchronous>, transform_indices = @transform_7, window_bounds = array<i64: 1, 32>}, {pipeline_mode = #tpu.pipeline_mode<synchronous>, transform_indices = @transform_8, window_bounds = array<i64: 1, 32>}, {pipeline_mode = #tpu.pipeline_mode<synchronous>, transform_indices = @transform_9, window_bounds = array<i64: 32, 32>}, {pipeline_mode = #tpu.pipeline_mode<synchronous>, transform_indices = @transform_10, window_bounds = array<i64: 1, 32>}, {pipeline_mode = #tpu.pipeline_mode<synchronous>, transform_indices = @transform_11, window_bounds = array<i64: 1, 32>}, {pipeline_mode = #tpu.pipeline_mode<synchronous>, transform_indices = @transform_12, window_bounds = array<i64: 1, 32>}, {pipeline_mode = #tpu.pipeline_mode<synchronous>, transform_indices = @transform_13, window_bounds = array<i64: 1, 32>}, {pipeline_mode = #tpu.pipeline_mode<synchronous>, transform_indices = @transform_14, window_bounds = array<i64: 8, 128>}]} {
    %c0_i32 = arith.constant 0 : i32
    %0 = arith.cmpi eq, %arg0, %c0_i32 : i32
    %1 = arith.extui %0 : i1 to i32
    %c0_i32_0 = arith.constant 0 : i32
    %2 = arith.cmpi ne, %1, %c0_i32_0 : i32
    scf.if %2 {
      %cst_45 = arith.constant 0.000000e+00 : f32
      %95 = vector.broadcast %cst_45 : f32 to vector<8x128xf32>
      %c0_46 = arith.constant 0 : index
      %c0_47 = arith.constant 0 : index
      %96 = vector.load %arg16[%c0_46, %c0_47] : memref<8x128xf32, #tpu.memory_space<vmem>>, vector<8x128xf32>
      tpu.vector_store %arg16[%c0_46, %c0_47], %95 {strides = array<i32>} : memref<8x128xf32, #tpu.memory_space<vmem>>, vector<8x128xf32>,
    } else {
    }
    %c0 = arith.constant 0 : index
    %c0_1 = arith.constant 0 : index
    %3 = vector.load %arg1[%c0, %c0_1] : memref<128x32xf32, #tpu.memory_space<vmem>>, vector<128x32xf32>
    %c0_2 = arith.constant 0 : index
    %c0_3 = arith.constant 0 : index
    %4 = vector.load %arg8[%c0_2, %c0_3] : memref<1x32xf32, #tpu.memory_space<vmem>>, vector<1x32xf32>
    %c0_4 = arith.constant 0 : index
    %c0_5 = arith.constant 0 : index
    %5 = vector.load %arg9[%c0_4, %c0_5] : memref<1x32xf32, #tpu.memory_space<vmem>>, vector<1x32xf32>
    %cst = arith.constant dense<0.000000e+00> : vector<128xf32>
    %6 = vector.multi_reduction <add>, %3, %cst [1] : vector<128x32xf32> to vector<128xf32>
    %7 = vector.shape_cast %6 : vector<128xf32> to vector<128x1xf32>
    %cst_6 = arith.constant 3.200000e+01 : f32
    %8 = vector.broadcast %cst_6 : f32 to vector<128x1xf32>
    %9 = arith.divf %7, %8 : vector<128x1xf32>
    %10 = arith.mulf %3, %3 : vector<128x32xf32>
    %cst_7 = arith.constant dense<0.000000e+00> : vector<128xf32>
    %11 = vector.multi_reduction <add>, %10, %cst_7 [1] : vector<128x32xf32> to vector<128xf32>
    %12 = vector.shape_cast %11 : vector<128xf32> to vector<128x1xf32>
    %cst_8 = arith.constant 3.200000e+01 : f32
    %13 = vector.broadcast %cst_8 : f32 to vector<128x1xf32>
    %14 = arith.divf %12, %13 : vector<128x1xf32>
    %15 = arith.mulf %9, %9 : vector<128x1xf32>
    %16 = arith.subf %14, %15 : vector<128x1xf32>
    %17 = vector.broadcast %9 : vector<128x1xf32> to vector<128x32xf32>
    %18 = arith.subf %3, %17 : vector<128x32xf32>
    %cst_9 = arith.constant 9.99999974E-6 : f32
    %19 = vector.broadcast %cst_9 : f32 to vector<128x1xf32>
    %20 = arith.addf %16, %19 : vector<128x1xf32>
    %21 = math.rsqrt %20 : vector<128x1xf32>
    %22 = vector.broadcast %21 : vector<128x1xf32> to vector<128x32xf32>
    %23 = arith.mulf %18, %22 : vector<128x32xf32>
    %24 = vector.broadcast %4 : vector<1x32xf32> to vector<128x32xf32>
    %25 = arith.mulf %23, %24 : vector<128x32xf32>
    %26 = vector.broadcast %5 : vector<1x32xf32> to vector<128x32xf32>
    %27 = arith.addf %25, %26 : vector<128x32xf32>
    %cst_10 = arith.constant 0.000000e+00 : f32
    %28 = vector.broadcast %cst_10 : f32 to vector<128x32xf32>
    %29 = arith.subf %28, %27 : vector<128x32xf32>
    %30 = math.exp %29 : vector<128x32xf32>
    %cst_11 = arith.constant 1.000000e+00 : f32
    %31 = vector.broadcast %cst_11 : f32 to vector<128x32xf32>
    %32 = arith.addf %31, %30 : vector<128x32xf32>
    %33 = tpu.reciprocal %32 {approx = true} : vector<128x32xf32> -> vector<128x32xf32>
    %34 = arith.mulf %27, %33 : vector<128x32xf32>
    %35 = arith.truncf %34 : vector<128x32xf32> to vector<128x32xbf16>
    %c0_12 = arith.constant 0 : index
    %c0_13 = arith.constant 0 : index
    %36 = vector.load %arg10[%c0_12, %c0_13] : memref<32x32xbf16, #tpu.memory_space<vmem>>, vector<32x32xbf16>
    %cst_14 = arith.constant dense<0.000000e+00> : vector<128x32xf32>
    %37 = tpu.matmul %35, %36, %cst_14 {dimension_numbers = #tpu.dot_dimension_numbers<[1], [0], [0], [1], [0, 0, 1, 1], [], []>} : vector<128x32xbf16>, vector<32x32xbf16>, vector<128x32xf32> -> vector<128x32xf32>
    %c0_15 = arith.constant 0 : index
    %c0_16 = arith.constant 0 : index
    %38 = vector.load %arg11[%c0_15, %c0_16] : memref<1x32xf32, #tpu.memory_space<vmem>>, vector<1x32xf32>
    %39 = vector.broadcast %38 : vector<1x32xf32> to vector<128x32xf32>
    %40 = arith.addf %37, %39 : vector<128x32xf32>
    %c0_17 = arith.constant 0 : index
    %c0_18 = arith.constant 0 : index
    %41 = vector.load %arg12[%c0_17, %c0_18] : memref<1x32xf32, #tpu.memory_space<vmem>>, vector<1x32xf32>
    %c0_19 = arith.constant 0 : index
    %c0_20 = arith.constant 0 : index
    %42 = vector.load %arg13[%c0_19, %c0_20] : memref<1x32xf32, #tpu.memory_space<vmem>>, vector<1x32xf32>
    %cst_21 = arith.constant dense<0.000000e+00> : vector<128xf32>
    %43 = vector.multi_reduction <add>, %40, %cst_21 [1] : vector<128x32xf32> to vector<128xf32>
    %44 = vector.shape_cast %43 : vector<128xf32> to vector<128x1xf32>
    %cst_22 = arith.constant 3.200000e+01 : f32
    %45 = vector.broadcast %cst_22 : f32 to vector<128x1xf32>
    %46 = arith.divf %44, %45 : vector<128x1xf32>
    %47 = arith.mulf %40, %40 : vector<128x32xf32>
    %cst_23 = arith.constant dense<0.000000e+00> : vector<128xf32>
    %48 = vector.multi_reduction <add>, %47, %cst_23 [1] : vector<128x32xf32> to vector<128xf32>
    %49 = vector.shape_cast %48 : vector<128xf32> to vector<128x1xf32>
    %cst_24 = arith.constant 3.200000e+01 : f32
    %50 = vector.broadcast %cst_24 : f32 to vector<128x1xf32>
    %51 = arith.divf %49, %50 : vector<128x1xf32>
    %52 = arith.mulf %46, %46 : vector<128x1xf32>
    %53 = arith.subf %51, %52 : vector<128x1xf32>
    %54 = vector.broadcast %46 : vector<128x1xf32> to vector<128x32xf32>
    %55 = arith.subf %40, %54 : vector<128x32xf32>
    %cst_25 = arith.constant 9.99999974E-6 : f32
    %56 = vector.broadcast %cst_25 : f32 to vector<128x1xf32>
    %57 = arith.addf %53, %56 : vector<128x1xf32>
    %58 = math.rsqrt %57 : vector<128x1xf32>
    %59 = vector.broadcast %58 : vector<128x1xf32> to vector<128x32xf32>
    %60 = arith.mulf %55, %59 : vector<128x32xf32>
    %61 = vector.broadcast %41 : vector<1x32xf32> to vector<128x32xf32>
    %62 = arith.mulf %60, %61 : vector<128x32xf32>
    %63 = vector.broadcast %42 : vector<1x32xf32> to vector<128x32xf32>
    %64 = arith.addf %62, %63 : vector<128x32xf32>
    %cst_26 = arith.constant 0.000000e+00 : f32
    %65 = vector.broadcast %cst_26 : f32 to vector<128x32xf32>
    %66 = arith.subf %65, %64 : vector<128x32xf32>
    %67 = math.exp %66 : vector<128x32xf32>
    %cst_27 = arith.constant 1.000000e+00 : f32
    %68 = vector.broadcast %cst_27 : f32 to vector<128x32xf32>
    %69 = arith.addf %68, %67 : vector<128x32xf32>
    %70 = tpu.reciprocal %69 {approx = true} : vector<128x32xf32> -> vector<128x32xf32>
    %71 = arith.mulf %64, %70 : vector<128x32xf32>
    %c0_28 = arith.constant 0 : index
    %c0_29 = arith.constant 0 : index
    %72 = vector.load %arg14[%c0_28, %c0_29] : memref<1x32xf32, #tpu.memory_space<vmem>>, vector<1x32xf32>
    %73 = vector.broadcast %72 : vector<1x32xf32> to vector<128x32xf32>
    %74 = arith.mulf %71, %73 : vector<128x32xf32>
    %cst_30 = arith.constant dense<0.000000e+00> : vector<128xf32>
    %75 = vector.multi_reduction <add>, %74, %cst_30 [1] : vector<128x32xf32> to vector<128xf32>
    %76 = vector.shape_cast %75 : vector<128xf32> to vector<128x1xf32>
    %c0_31 = arith.constant 0 : index
    %c0_32 = arith.constant 0 : index
    %77 = vector.load %arg3[%c0_31, %c0_32] : memref<128x1xf32, #tpu.memory_space<vmem>>, vector<128x1xf32>
    %78 = arith.mulf %76, %77 : vector<128x1xf32>
    %79 = tpu.iota {dimensions = array<i32: 1>} : vector<128x128xi32>
    %c0_33 = arith.constant 0 : index
    %c0_34 = arith.constant 0 : index
    %80 = vector.load %arg4[%c0_33, %c0_34] : memref<128x1xi32, #tpu.memory_space<vmem>>, vector<128x1xi32>
    %81 = vector.broadcast %80 : vector<128x1xi32> to vector<128x128xi32>
    %82 = arith.cmpi eq, %79, %81 : vector<128x128xi32>
    %cst_35 = arith.constant 0.000000e+00 : f32
    %83 = vector.shape_cast %78 : vector<128x1xf32> to vector<128x1xf32>
    %84 = vector.broadcast %83 : vector<128x1xf32> to vector<128x128xf32>
    %85 = vector.broadcast %cst_35 : f32 to vector<128x128xf32>
    %86 = arith.select %82, %84, %85 : vector<128x128xi1>, vector<128x128xf32>
    %c0_36 = arith.constant 0 : index
    %c0_37 = arith.constant 0 : index
    %87 = vector.load %arg16[%c0_36, %c0_37] : memref<8x128xf32, #tpu.memory_space<vmem>>, vector<8x128xf32>
    %c0_38 = arith.constant 0 : index
    %c0_39 = arith.constant 0 : index
    %88 = vector.load %arg2[%c0_38, %c0_39] : memref<8x128xf32, #tpu.memory_space<vmem>>, vector<8x128xf32>
    %cst_40 = arith.constant dense<0.000000e+00> : vector<8x128xf32>
    %89 = tpu.matmul %88, %86, %cst_40 {dimension_numbers = #tpu.dot_dimension_numbers<[1], [0], [0], [1], [0, 0, 1, 1], [], []>} : vector<8x128xf32>, vector<128x128xf32>, vector<8x128xf32> -> vector<8x128xf32>
    %90 = arith.addf %87, %89 : vector<8x128xf32>
    %c0_41 = arith.constant 0 : index
    %c0_42 = arith.constant 0 : index
    %91 = vector.load %arg16[%c0_41, %c0_42] : memref<8x128xf32, #tpu.memory_space<vmem>>, vector<8x128xf32>
    tpu.vector_store %arg16[%c0_41, %c0_42], %90 {strides = array<i32>} : memref<8x128xf32, #tpu.memory_space<vmem>>, vector<8x128xf32>,
    %c0_i32_43 = arith.constant 0 : i32
    %92 = arith.cmpi eq, %arg0, %c0_i32_43 : i32
    %93 = arith.extui %92 : i1 to i32
    %c0_i32_44 = arith.constant 0 : i32
    %94 = arith.cmpi ne, %93, %c0_i32_44 : i32
    scf.if %94 {
      %c0_45 = arith.constant 0 : index
      %c0_46 = arith.constant 0 : index
      %95 = vector.load %arg16[%c0_45, %c0_46] : memref<8x128xf32, #tpu.memory_space<vmem>>, vector<8x128xf32>
      %c0_47 = arith.constant 0 : index
      %c0_48 = arith.constant 0 : index
      %96 = vector.load %arg7[%c0_47, %c0_48] : memref<1x128xf32, #tpu.memory_space<vmem>>, vector<1x128xf32>
      %97 = vector.broadcast %96 : vector<1x128xf32> to vector<8x128xf32>
      %98 = arith.divf %95, %97 : vector<8x128xf32>
      %c0_49 = arith.constant 0 : index
      %c0_50 = arith.constant 0 : index
      %99 = vector.load %arg5[%c0_49, %c0_50] : memref<8x128xf32, #tpu.memory_space<vmem>>, vector<8x128xf32>
      %100 = arith.addf %99, %98 : vector<8x128xf32>
      %c0_51 = arith.constant 0 : index
      %c0_52 = arith.constant 0 : index
      %101 = vector.load %arg6[%c0_51, %c0_52] : memref<1x128xf32, #tpu.memory_space<vmem>>, vector<1x128xf32>
      %102 = vector.broadcast %101 : vector<1x128xf32> to vector<8x128xf32>
      %103 = arith.mulf %100, %102 : vector<8x128xf32>
      %c0_53 = arith.constant 0 : index
      %c0_54 = arith.constant 0 : index
      %104 = vector.load %arg15[%c0_53, %c0_54] : memref<8x128xf32, #tpu.memory_space<vmem>>, vector<8x128xf32>
      tpu.vector_store %arg15[%c0_53, %c0_54], %103 {strides = array<i32>} : memref<8x128xf32, #tpu.memory_space<vmem>>, vector<8x128xf32>,
    } else {
    }
    return
  }
  func.func @transform_0(%arg0: i32) -> (i32, i32) {
    %c0_i32 = arith.constant 0 : i32
    %c0_i32_0 = arith.constant 0 : i32
    return %arg0, %c0_i32 : i32, i32
  }
  func.func @transform_1(%arg0: i32) -> (i32, i32) {
    %c0_i32 = arith.constant 0 : i32
    %c0_i32_0 = arith.constant 0 : i32
    return %c0_i32, %arg0 : i32, i32
  }
  func.func @transform_2(%arg0: i32) -> (i32, i32) {
    %c0_i32 = arith.constant 0 : i32
    %c0_i32_0 = arith.constant 0 : i32
    return %arg0, %c0_i32 : i32, i32
  }
  func.func @transform_3(%arg0: i32) -> (i32, i32) {
    %c0_i32 = arith.constant 0 : i32
    %c0_i32_0 = arith.constant 0 : i32
    return %arg0, %c0_i32 : i32, i32
  }
  func.func @transform_4(%arg0: i32) -> (i32, i32) {
    %c0_i32 = arith.constant 0 : i32
    %c0_i32_0 = arith.constant 0 : i32
    %c0_i32_1 = arith.constant 0 : i32
    return %c0_i32, %c0_i32_0 : i32, i32
  }
  func.func @transform_5(%arg0: i32) -> (i32, i32) {
    %c0_i32 = arith.constant 0 : i32
    %c0_i32_0 = arith.constant 0 : i32
    %c0_i32_1 = arith.constant 0 : i32
    return %c0_i32, %c0_i32_0 : i32, i32
  }
  func.func @transform_6(%arg0: i32) -> (i32, i32) {
    %c0_i32 = arith.constant 0 : i32
    %c0_i32_0 = arith.constant 0 : i32
    %c0_i32_1 = arith.constant 0 : i32
    return %c0_i32, %c0_i32_0 : i32, i32
  }
  func.func @transform_7(%arg0: i32) -> (i32, i32) {
    %c0_i32 = arith.constant 0 : i32
    %c0_i32_0 = arith.constant 0 : i32
    %c0_i32_1 = arith.constant 0 : i32
    return %c0_i32, %c0_i32_0 : i32, i32
  }
  func.func @transform_8(%arg0: i32) -> (i32, i32) {
    %c0_i32 = arith.constant 0 : i32
    %c0_i32_0 = arith.constant 0 : i32
    %c0_i32_1 = arith.constant 0 : i32
    return %c0_i32, %c0_i32_0 : i32, i32
  }
  func.func @transform_9(%arg0: i32) -> (i32, i32) {
    %c0_i32 = arith.constant 0 : i32
    %c0_i32_0 = arith.constant 0 : i32
    %c0_i32_1 = arith.constant 0 : i32
    return %c0_i32, %c0_i32_0 : i32, i32
  }
  func.func @transform_10(%arg0: i32) -> (i32, i32) {
    %c0_i32 = arith.constant 0 : i32
    %c0_i32_0 = arith.constant 0 : i32
    %c0_i32_1 = arith.constant 0 : i32
    return %c0_i32, %c0_i32_0 : i32, i32
  }
  func.func @transform_11(%arg0: i32) -> (i32, i32) {
    %c0_i32 = arith.constant 0 : i32
    %c0_i32_0 = arith.constant 0 : i32
    %c0_i32_1 = arith.constant 0 : i32
    return %c0_i32, %c0_i32_0 : i32, i32
  }
  func.func @transform_12(%arg0: i32) -> (i32, i32) {
    %c0_i32 = arith.constant 0 : i32
    %c0_i32_0 = arith.constant 0 : i32
    %c0_i32_1 = arith.constant 0 : i32
    return %c0_i32, %c0_i32_0 : i32, i32
  }
  func.func @transform_13(%arg0: i32) -> (i32, i32) {
    %c0_i32 = arith.constant 0 : i32
    %c0_i32_0 = arith.constant 0 : i32
    %c0_i32_1 = arith.constant 0 : i32
    return %c0_i32, %c0_i32_0 : i32, i32
  }
  func.func @transform_14(%arg0: i32) -> (i32, i32) {
    %c0_i32 = arith.constant 0 : i32
    %c0_i32_0 = arith.constant 0 : i32
    %c0_i32_1 = arith.constant 0 : i32
    return %c0_i32, %c0_i32_0 : i32, i32
  }
}

</mosaic_0001>

<bundles_post_ra>
// kernel: tpu_custom_call.1
= control target key start
LH: loop header
LB: loop body
LE: loop exit
PB: predicated region body
PF: predicated region fallthrough
CT: control target
= control target key end

     0   :  { %vm72_vm0 = vcmask 261120   ;;  %s2690_s0 = inlined_call_operand.vmem [shape: f32[128,32], index: 0, kind: input, shape index: {}]   ;;  %s2691_s1 = inlined_call_operand.vmem [shape: f32[8,128], index: 1, kind: input, shape index: {}]   ;;  %s2692_s2 = inlined_call_operand.vmem [shape: f32[128,1], index: 2, kind: input, shape index: {}]   ;;  %s2693_s3 = inlined_call_operand.vmem [shape: s32[128,1], index: 3, kind: input, shape index: {}]   ;;  %s2694_s4 = inlined_call_operand.vmem [shape: f32[8,128], index: 4, kind: input, shape index: {}]   ;;  %s2695_s5 = inlined_call_operand.vmem [shape: f32[1,128], index: 5, kind: input, shape index: {}]   ;;  %s2696_s6 = inlined_call_operand.vmem [shape: f32[1,128], index: 6, kind: input, shape index: {}]   ;;  %s2697_s7 = inlined_call_operand.vmem [shape: f32[1,32], index: 7, kind: input, shape index: {}]   ;;  %s2698_s8 = inlined_call_operand.vmem [shape: f32[1,32], index: 8, kind: input, shape index: {}]   ;;  %s2699_s9 = inlined_call_operand.vmem [shape: bf16[32,32], index: 9, kind: input, shape index: {}]   ;;  %s2700_s10 = inlined_call_operand.vmem [shape: f32[1,32], index: 10, kind: input, shape index: {}]   ;;  %s2701_s11 = inlined_call_operand.vmem [shape: f32[1,32], index: 11, kind: input, shape index: {}]   ;;  %s2702_s12 = inlined_call_operand.vmem [shape: f32[1,32], index: 12, kind: input, shape index: {}]   ;;  %s2703_s13 = inlined_call_operand.vmem [shape: f32[1,32], index: 13, kind: input, shape index: {}]   ;;  %s2704_s14 = inlined_call_operand.hbm [shape: f32[8,128], index: 14, kind: output, shape index: {}]  }
   0x1   :  { %v1803_v0 = vld [vmem:[%s2690_s0 + $0x10] sm:$0xff]  ;;  %v1808_v1 = vld [vmem:[%s2690_s0] sm:$0xff]  ;;  %v1813_v2 = vld [vmem:[%s2690_s0 + $0x18] sm:$0xff] }
   0x2   :  { %v79_v3 = vsel %vm72_vm0, %v1803_v0, 0.0  ;;  %v73_v4 = vsel %vm72_vm0, %v1808_v1, 0.0  ;;  %v1822_v5 = vld [vmem:[%s2690_s0 + $0x8] sm:$0xff]  ;;  %v82_v6 = vsel %vm72_vm0, %v1813_v2, 0.0  ;;  %v138_v9 = vmul.f32 %v1808_v1, %v1808_v1 }
   0x3   :  { %80 = vadd.xlane.f32.xlu1 %v79_v3  ;;  %74 = vadd.xlane.f32.xlu0 %v73_v4  ;;  %v76_v7 = vsel %vm72_vm0, %v1822_v5, 0.0  ;;  %v139_v8 = vmul.f32 %v1822_v5, %v1822_v5  ;;  %v141_v12 = vmul.f32 %v1813_v2, %v1813_v2  ;;  %v140_v13 = vmul.f32 %v1803_v0, %v1803_v0 }
   0x4   :  { %v154_v11 = vsel %vm72_vm0, %v138_v9, 0.0 }
   0x5   :  { %v157_v10 = vsel %vm72_vm0, %v139_v8, 0.0 }
   0x7   :  { %83 = vadd.xlane.f32.xlu1 %v82_v6  ;;  %77 = vadd.xlane.f32.xlu0 %v76_v7 }
   0x8   :  { %19 = vsyncpa [#allocation4], 0  ;;  %v163_v14 = vsel %vm72_vm0, %v141_v12, 0.0  ;;  %v160_v15 = vsel %vm72_vm0, %v140_v13, 0.0  ;;  %v1843_v16 = vld [vmem:[%s2690_s0 + $0x28] sm:$0xff]  ;;  %v1848_v17 = vld [vmem:[%s2690_s0 + $0x20] sm:$0xff] }
   0x9   :  { %v88_v18 = vsel %vm72_vm0, %v1843_v16, 0.0  ;;  %v85_v19 = vsel %vm72_vm0, %v1848_v17, 0.0  ;;  %v1857_v20 = vld [vmem:[%s2690_s0 + $0x38] sm:$0xff]  ;;  %v1862_v21 = vld [vmem:[%s2690_s0 + $0x30] sm:$0xff]  ;;  %v143_v24 = vmul.f32 %v1843_v16, %v1843_v16  ;;  %v142_v25 = vmul.f32 %v1848_v17, %v1848_v17  ;;  %v1883_v32 = vld [vmem:[%s2690_s0 + $0x48] sm:$0xff]  ;;  %s1724_s21 = smov [#allocation3]  }
   0xa   :  { %v94_v22 = vsel %vm72_vm0, %v1857_v20, 0.0  ;;  %v91_v23 = vsel %vm72_vm0, %v1862_v21, 0.0  ;;  %v145_v28 = vmul.f32 %v1857_v20, %v1857_v20  ;;  %v144_v29 = vmul.f32 %v1862_v21, %v1862_v21  ;;  %v1888_v33 = vld [vmem:[%s2690_s0 + $0x40] sm:$0xff]  ;;  %v1897_v36 = vld [vmem:[%s2690_s0 + $0x58] sm:$0xff]  ;;  %v1902_v37 = vld [vmem:[%s2690_s0 + $0x50] sm:$0xff] }
   0xb   :  { %158 = vadd.xlane.f32.xlu1 %v157_v10  ;;  %155 = vadd.xlane.f32.xlu0 %v154_v11  ;;  %v169_v26 = vsel %vm72_vm0, %v143_v24, 0.0  ;;  %v166_v27 = vsel %vm72_vm0, %v142_v25, 0.0  ;;  %v100_v34 = vsel %vm72_vm0, %v1883_v32, 0.0  ;;  %v97_v35 = vsel %vm72_vm0, %v1888_v33, 0.0  ;;  %v1923_v48 = vld [vmem:[%s2690_s0 + $0x68] sm:$0xff]  ;;  %v1928_v49 = vld [vmem:[%s2690_s0 + $0x60] sm:$0xff] }
   0xc   :  { %v175_v30 = vsel %vm72_vm0, %v145_v28, 0.0  ;;  %v172_v31 = vsel %vm72_vm0, %v144_v29, 0.0  ;;  %v106_v38 = vsel %vm72_vm0, %v1897_v36, 0.0  ;;  %v103_v39 = vsel %vm72_vm0, %v1902_v37, 0.0  ;;  %v1937_v52 = vld [vmem:[%s2690_s0 + $0x78] sm:$0xff]  ;;  %v1942_v53 = vld [vmem:[%s2690_s0 + $0x70] sm:$0xff] }
   0xd   :  { %v147_v40 = vmul.f32 %v1883_v32, %v1883_v32  ;;  %v146_v41 = vmul.f32 %v1888_v33, %v1888_v33  ;;  %v149_v44 = vmul.f32 %v1897_v36, %v1897_v36  ;;  %v148_v45 = vmul.f32 %v1902_v37, %v1902_v37  ;;  %v1503_v3 = vld [vmem:[%s2699_s9 + $0x8] sm:$0xff]   ;;  %v1504_v4 = vld [vmem:[%s2699_s9] sm:$0xff]  }
   0xe   :  { %v112_v50 = vsel %vm72_vm0, %v1923_v48, 0.0  ;;  %v109_v51 = vsel %vm72_vm0, %v1928_v49, 0.0  ;;  %v118_v54 = vsel %vm72_vm0, %v1937_v52, 0.0  ;;  %v115_v55 = vsel %vm72_vm0, %v1942_v53, 0.0  ;;  %1442 = vmatprep.subr.bf16.mxu0 %v1503_v3 }
   0xf   :  { %164 = vadd.xlane.f32.xlu1 %v163_v14  ;;  %161 = vadd.xlane.f32.xlu0 %v160_v15  ;;  %v181_v42 = vsel %vm72_vm0, %v147_v40, 0.0  ;;  %v178_v43 = vsel %vm72_vm0, %v146_v41, 0.0  ;;  %v187_v46 = vsel %vm72_vm0, %v149_v44, 0.0  ;;  %v184_v47 = vsel %vm72_vm0, %v148_v45, 0.0 }
  0x10   :  { %v151_v56 = vmul.f32 %v1923_v48, %v1923_v48  ;;  %v150_v57 = vmul.f32 %v1928_v49, %v1928_v49  ;;  %v153_v60 = vmul.f32 %v1937_v52, %v1937_v52  ;;  %v152_v61 = vmul.f32 %v1942_v53, %v1942_v53  ;;  %1443 = vmatpush3.bf16.msra.mxu0 %v1503_v3 }
  0x11   :  { %1444 = vmatprep.subr.bf16.mxu0 %v1504_v4  ;;  %vm1723_vm1 = vmmov 0  }
  0x12   :  { %v193_v58 = vsel %vm72_vm0, %v151_v56, 0.0  ;;  %v190_v59 = vsel %vm72_vm0, %v150_v57, 0.0  ;;  %v199_v62 = vsel %vm72_vm0, %v153_v60, 0.0  ;;  %v196_v63 = vsel %vm72_vm0, %v152_v61, 0.0 }
  0x13   :  { %89 = vadd.xlane.f32.xlu1 %v88_v18  ;;  %86 = vadd.xlane.f32.xlu0 %v85_v19 }
  0x14   :  { %1445 = vmatpush3.bf16.msra.mxu0 %v1504_v4 }
  0x17   :  { %95 = vadd.xlane.f32.xlu1 %v94_v22  ;;  %92 = vadd.xlane.f32.xlu0 %v91_v23 }
  0x1b   :  { %170 = vadd.xlane.f32.xlu1 %v169_v26  ;;  %167 = vadd.xlane.f32.xlu0 %v166_v27 }
  0x1f   :  { %176 = vadd.xlane.f32.xlu1 %v175_v30  ;;  %173 = vadd.xlane.f32.xlu0 %v172_v31 }
  0x23   :  { %101 = vadd.xlane.f32.xlu1 %v100_v34  ;;  %98 = vadd.xlane.f32.xlu0 %v97_v35 }
  0x27   :  { %107 = vadd.xlane.f32.xlu1 %v106_v38  ;;  %104 = vadd.xlane.f32.xlu0 %v103_v39 }
  0x2b   :  { %182 = vadd.xlane.f32.xlu1 %v181_v42  ;;  %179 = vadd.xlane.f32.xlu0 %v178_v43 }
  0x2f   :  { %188 = vadd.xlane.f32.xlu1 %v187_v46  ;;  %185 = vadd.xlane.f32.xlu0 %v184_v47 }
  0x33   :  { %113 = vadd.xlane.f32.xlu1 %v112_v50  ;;  %110 = vadd.xlane.f32.xlu0 %v109_v51 }
  0x37   :  { %119 = vadd.xlane.f32.xlu1 %v118_v54  ;;  %116 = vadd.xlane.f32.xlu0 %v115_v55 }
  0x3b   :  { %194 = vadd.xlane.f32.xlu1 %v193_v58  ;;  %191 = vadd.xlane.f32.xlu0 %v190_v59 }
  0x3f   :  { %200 = vadd.xlane.f32.xlu1 %v199_v62  ;;  %197 = vadd.xlane.f32.xlu0 %v196_v63 }
  0x8c   :  { %v81_v6 = vpop.xlane.xlu1 %80  ;;  %v75_v7 = vpop.xlane.xlu0 %74 }
  0x8d   :  { %v122_v10 = vmul.f32 0.03125, %v75_v7  ;;  %v1966_v12 = vmul.f32 0.03125, %v81_v6 }
  0x8f   :  { %v218_v18 = vmul.f32 %v122_v10, %v122_v10  ;;  %v220_v26 = vmul.f32 %v1966_v12, %v1966_v12  ;;  %v250_v63 = vsub.f32 %v1808_v1, %v122_v10 }
  0x90   :  { %v84_v8 = vpop.xlane.xlu1 %83  ;;  %v78_v9 = vpop.xlane.xlu0 %77 }
  0x91   :  { %v123_v11 = vmul.f32 0.03125, %v78_v9  ;;  %v1968_v13 = vmul.f32 0.03125, %v84_v8  ;;  %v1995_v9 = vld [vmem:[%s2697_s7] ss:$0 sm:$0xff] }
  0x93   :  { %v219_v19 = vmul.f32 %v123_v11, %v123_v11  ;;  %v221_v27 = vmul.f32 %v1968_v13, %v1968_v13  ;;  %v251_v3 = vsub.f32 %v1822_v5, %v123_v11  ;;  %v252_v11 = vsub.f32 %v1803_v0, %v1966_v12 }
  0x94   :  { %v159_v14 = vpop.xlane.xlu1 %158  ;;  %v156_v15 = vpop.xlane.xlu0 %155 }
  0x95   :  { %v203_v22 = vmul.f32 0.03125, %v159_v14  ;;  %v202_v23 = vmul.f32 0.03125, %v156_v15 }
  0x97   :  { %v235_v24 = vsub.f32 %v203_v22, %v219_v19  ;;  %v234_v25 = vsub.f32 %v202_v23, %v218_v18 }
  0x98   :  { %v165_v28 = vpop.xlane.xlu1 %164  ;;  %v162_v29 = vpop.xlane.xlu0 %161 }
  0x99   :  { %v267_v30 = vadd.f32 1e-05, %v235_v24  ;;  %v266_v31 = vadd.f32 1e-05, %v234_v25  ;;  %v205_v34 = vmul.f32 0.03125, %v165_v28  ;;  %v204_v35 = vmul.f32 0.03125, %v162_v29 }
  0x9a   :  { %v2002_v24 = vld [vmem:[%s2698_s8] ss:$0 sm:$0xff] }
  0x9b   :  { %1505 = vrsqrt.f32 %v267_v30  ;;  %v237_v38 = vsub.f32 %v205_v34, %v221_v27  ;;  %v236_v39 = vsub.f32 %v204_v35, %v220_v26  ;;  %v253_v26 = vsub.f32 %v1813_v2, %v1968_v13 }
  0x9c   :  { %1507 = vrsqrt.f32 %v266_v31  ;;  %v90_v40 = vpop.xlane.xlu1 %89  ;;  %v87_v41 = vpop.xlane.xlu0 %86 }
  0x9d   :  { %v269_v42 = vadd.f32 1e-05, %v237_v38  ;;  %v268_v43 = vadd.f32 1e-05, %v236_v39  ;;  %v1974_v46 = vmul.f32 0.03125, %v90_v40  ;;  %v1976_v47 = vmul.f32 0.03125, %v87_v41 }
  0x9f   :  { %1509 = vrsqrt.f32 %v269_v42  ;;  %v223_v56 = vmul.f32 %v1974_v46, %v1974_v46  ;;  %v222_v57 = vmul.f32 %v1976_v47, %v1976_v47 }
  0xa0   :  { %1511 = vrsqrt.f32 %v268_v43  ;;  %v96_v44 = vpop.xlane.xlu1 %95  ;;  %v93_v45 = vpop.xlane.xlu0 %92 }
  0xa1   :  { %v1978_v50 = vmul.f32 0.03125, %v96_v44  ;;  %v1980_v51 = vmul.f32 0.03125, %v93_v45 }
  0xa3   :  { %v225_v4 = vmul.f32 %v1978_v50, %v1978_v50  ;;  %v224_v6 = vmul.f32 %v1980_v51, %v1980_v51 }
  0xa4   :  { %v171_v54 = vpop.xlane.xlu1 %170  ;;  %v168_v55 = vpop.xlane.xlu0 %167 }
  0xa5   :  { %v207_v58 = vmul.f32 0.03125, %v171_v54  ;;  %v206_v59 = vmul.f32 0.03125, %v168_v55 }
  0xa7   :  { %v239_v60 = vsub.f32 %v207_v58, %v223_v56  ;;  %v238_v61 = vsub.f32 %v206_v59, %v222_v57 }
  0xa8   :  { %v1506_v62 = vpop.eup %1505  ;;  %v177_v7 = vpop.xlane.xlu1 %176 }
  0xa9   :  { %v174_v8 = vpop.xlane.xlu0 %173  ;;  %v1508_v14 = vpop.eup %1507  ;;  %v271_v15 = vadd.f32 1e-05, %v239_v60  ;;  %v270_v18 = vadd.f32 1e-05, %v238_v61  ;;  %v209_v19 = vmul.f32 0.03125, %v177_v7  ;;  %v299_v5 = vmul.f32 %v1506_v62, %v251_v3 }
  0xaa   :  { %v208_v1 = vmul.f32 0.03125, %v174_v8  ;;  %v298_v10 = vmul.f32 %v1508_v14, %v250_v63  ;;  %v255_v8 = vsub.f32 %v1843_v16, %v1974_v46 }
  0xab   :  { %1513 = vrsqrt.f32 %v271_v15  ;;  %v241_v22 = vsub.f32 %v209_v19, %v225_v4  ;;  %v321_v30 = vmul.f32 %v1995_v9, %v299_v5  ;;  %v254_v19 = vsub.f32 %v1848_v17, %v1976_v47 }
  0xac   :  { %v240_v23 = vsub.f32 %v208_v1, %v224_v6  ;;  %v1510_v25 = vpop.eup %1509  ;;  %1515 = vrsqrt.f32 %v270_v18  ;;  %v102_v27 = vpop.xlane.xlu1 %101  ;;  %v320_v29 = vmul.f32 %v1995_v9, %v298_v10 }
  0xad   :  { %v99_v28 = vpop.xlane.xlu0 %98  ;;  %v1512_v0 = vpop.eup %1511  ;;  %v273_v12 = vadd.f32 1e-05, %v241_v22  ;;  %v2012_v35 = vadd.f32 %v2002_v24, %v321_v30  ;;  %v301_v39 = vmul.f32 %v1510_v25, %v253_v26  ;;  %v2014_v40 = vmul.f32 0.03125, %v102_v27 }
  0xae   :  { %v272_v31 = vadd.f32 1e-05, %v240_v23  ;;  %v2009_v34 = vadd.f32 %v2002_v24, %v320_v29  ;;  %v300_v38 = vmul.f32 %v1512_v0, %v252_v11  ;;  %v2018_v43 = vmul.f32 0.03125, %v99_v28 }
  0xaf   :  { %v359_v42 = vsub.f32 0.0, %v2012_v35  ;;  %v323_v45 = vmul.f32 %v1995_v9, %v301_v39  ;;  %v227_v56 = vmul.f32 %v2014_v40, %v2014_v40  ;;  %v256_v30 = vsub.f32 %v1862_v21, %v1980_v51 }
  0xb0   :  { %1517 = vrsqrt.f32 %v272_v31  ;;  %v108_v2 = vpop.xlane.xlu1 %107  ;;  %v358_v41 = vsub.f32 0.0, %v2009_v34  ;;  %v322_v44 = vmul.f32 %v1995_v9, %v300_v38  ;;  %v226_v63 = vmul.f32 %v2018_v43, %v2018_v43 }
  0xb1   :  { %v105_v13 = vpop.xlane.xlu0 %104  ;;  %1519 = vrsqrt.f32 %v273_v12  ;;  %v376_v55 = vmul.f32 1.442695, %v359_v42  ;;  %v2024_v57 = vmul.f32 0.03125, %v108_v2  ;;  %v2032_v62 = vadd.f32 %v2002_v24, %v323_v45 }
  0xb2   :  { %v374_v54 = vmul.f32 1.442695, %v358_v41  ;;  %v2026_v58 = vmul.f32 0.03125, %v105_v13  ;;  %v2029_v61 = vadd.f32 %v2002_v24, %v322_v44  ;;  %v257_v21 = vsub.f32 %v1857_v20, %v1978_v50 }
  0xb3   :  { %v361_v7 = vsub.f32 0.0, %v2032_v62  ;;  %v229_v1 = vmul.f32 %v2024_v57, %v2024_v57  ;;  %v259_v20 = vsub.f32 %v1883_v32, %v2014_v40  ;;  %v258_v50 = vsub.f32 %v1888_v33, %v2018_v43 }
  0xb4   :  { %v183_v59 = vpop.xlane.xlu1 %182  ;;  %1521 = vpow2.f32 %v374_v54  ;;  %v360_v6 = vsub.f32 0.0, %v2029_v61  ;;  %v228_v10 = vmul.f32 %v2026_v58, %v2026_v58 }
  0xb5   :  { %v180_v60 = vpop.xlane.xlu0 %179  ;;  %v211_v3 = vmul.f32 0.03125, %v183_v59  ;;  %1523 = vpow2.f32 %v376_v55  ;;  %v380_v46 = vmul.f32 1.442695, %v361_v7 }
  0xb6   :  { %v210_v4 = vmul.f32 0.03125, %v180_v60  ;;  %v378_v22 = vmul.f32 1.442695, %v360_v6 }
  0xb7   :  { %v243_v14 = vsub.f32 %v211_v3, %v227_v56 }
  0xb8   :  { %v242_v15 = vsub.f32 %v210_v4, %v226_v63  ;;  %v1514_v18 = vpop.eup %1513  ;;  %v189_v5 = vpop.xlane.xlu1 %188  ;;  %1525 = vpow2.f32 %v378_v22  ;;  %v261_v22 = vsub.f32 %v1897_v36, %v2024_v57 }
  0xb9   :  { %v186_v11 = vpop.xlane.xlu0 %185  ;;  %v1516_v23 = vpop.eup %1515  ;;  %v275_v25 = vadd.f32 1e-05, %v243_v14  ;;  %v213_v27 = vmul.f32 0.03125, %v189_v5  ;;  %v303_v29 = vmul.f32 %v1514_v18, %v255_v8 }
  0xba   :  { %v274_v26 = vadd.f32 1e-05, %v242_v15  ;;  %v212_v16 = vmul.f32 0.03125, %v186_v11  ;;  %v302_v28 = vmul.f32 %v1516_v23, %v254_v19 }
  0xbb   :  { %1527 = vrsqrt.f32 %v275_v25  ;;  %v245_v17 = vsub.f32 %v213_v27, %v229_v1  ;;  %v325_v38 = vmul.f32 %v1995_v9, %v303_v29 }
  0xbc   :  { %v244_v47 = vsub.f32 %v212_v16, %v228_v10  ;;  %1529 = vrsqrt.f32 %v274_v26  ;;  %v114_v0 = vpop.xlane.xlu1 %113  ;;  %v324_v31 = vmul.f32 %v1995_v9, %v302_v28 }
  0xbd   :  { %v111_v12 = vpop.xlane.xlu0 %110  ;;  %v1518_v39 = vpop.eup %1517  ;;  %v277_v2 = vadd.f32 1e-05, %v245_v17  ;;  %1531 = vpow2.f32 %v380_v46  ;;  %v2054_v44 = vadd.f32 %v2002_v24, %v325_v38  ;;  %v2058_v51 = vmul.f32 0.03125, %v114_v0 }
  0xbe   :  { %v276_v13 = vadd.f32 1e-05, %v244_v47  ;;  %v1520_v41 = vpop.eup %1519  ;;  %v2051_v42 = vadd.f32 %v2002_v24, %v324_v31  ;;  %v304_v45 = vmul.f32 %v1518_v39, %v256_v30  ;;  %v2062_v63 = vmul.f32 0.03125, %v111_v12 }
  0xbf   :  { %1533 = vrsqrt.f32 %v277_v2  ;;  %v363_v59 = vsub.f32 0.0, %v2054_v44  ;;  %v305_v3 = vmul.f32 %v1520_v41, %v257_v21  ;;  %v231_v14 = vmul.f32 %v2058_v51, %v2058_v51 }
  0xc0   :  { %1535 = vrsqrt.f32 %v276_v13  ;;  %v120_v54 = vpop.xlane.xlu1 %119  ;;  %v362_v56 = vsub.f32 0.0, %v2051_v42  ;;  %v326_v4 = vmul.f32 %v1995_v9, %v304_v45  ;;  %v230_v33 = vmul.f32 %v2062_v63, %v2062_v63 }
  0xc1   :  { %v117_v55 = vpop.xlane.xlu0 %116  ;;  %v1522_v60 = vpop.eup %1521  ;;  %v2071_v15 = vmul.f32 0.03125, %v120_v54  ;;  %v384_v19 = vmul.f32 1.442695, %v363_v59  ;;  %v327_v11 = vmul.f32 %v1995_v9, %v305_v3  ;;  %v260_v2 = vsub.f32 %v1902_v37, %v2026_v58 }
  0xc2   :  { %v1524_v6 = vpop.eup %1523  ;;  %v406_v7 = vadd.f32 1.0, %v1522_v60  ;;  %v382_v8 = vmul.f32 1.442695, %v362_v56  ;;  %v2073_v18 = vmul.f32 0.03125, %v117_v55  ;;  %v2077_v32 = vadd.f32 %v2002_v24, %v326_v4 }
  0xc3   :  { %v407_v5 = vadd.f32 1.0, %v1524_v6  ;;  %v2084_v23 = vadd.f32 %v2002_v24, %v327_v11  ;;  %v233_v27 = vmul.f32 %v2071_v15, %v2071_v15 }
  0xc4   :  { %v195_v1 = vpop.xlane.xlu1 %194  ;;  %1537 = vrcp.f32 %v406_v7  ;;  %v364_v25 = vsub.f32 0.0, %v2077_v32  ;;  %v232_v29 = vmul.f32 %v2073_v18, %v2073_v18 }
  0xc5   :  { %v192_v10 = vpop.xlane.xlu0 %191  ;;  %v215_v40 = vmul.f32 0.03125, %v195_v1  ;;  %1539 = vpow2.f32 %v382_v8  ;;  %v1526_v26 = vpop.eup %1525  ;;  %v365_v57 = vsub.f32 0.0, %v2084_v23 }
  0xc6   :  { %v214_v43 = vmul.f32 0.03125, %v192_v10  ;;  %1541 = vrcp.f32 %v407_v5  ;;  %v408_v36 = vadd.f32 1.0, %v1526_v26  ;;  %v386_v30 = vmul.f32 1.442695, %v364_v25 }
  0xc7   :  { %v247_v16 = vsub.f32 %v215_v40, %v231_v14  ;;  %1543 = vpow2.f32 %v384_v19  ;;  %v388_v55 = vmul.f32 1.442695, %v365_v57  ;;  %v263_v57 = vsub.f32 %v1923_v48, %v2058_v51 }
  0xc8   :  { %v246_v46 = vsub.f32 %v214_v43, %v230_v33  ;;  %v1528_v28 = vpop.eup %1527  ;;  %v201_v17 = vpop.xlane.xlu1 %200  ;;  %1545 = vrcp.f32 %v408_v36 }
  0xc9   :  { %v198_v47 = vpop.xlane.xlu0 %197  ;;  %v1530_v0 = vpop.eup %1529  ;;  %v279_v12 = vadd.f32 1e-05, %v247_v16  ;;  %v217_v38 = vmul.f32 0.03125, %v201_v17  ;;  %v307_v41 = vmul.f32 %v1528_v28, %v259_v20 }
  0xca   :  { %v278_v31 = vadd.f32 1e-05, %v246_v46  ;;  %v216_v39 = vmul.f32 0.03125, %v198_v47  ;;  %v306_v13 = vmul.f32 %v1530_v0, %v258_v50  ;;  %v1532_v45 = vpop.eup %1531  ;;  %v262_v0 = vsub.f32 %v1928_v49, %v2062_v63 }
  0xcb   :  { %1547 = vrsqrt.f32 %v279_v12  ;;  %v249_v21 = vsub.f32 %v217_v38, %v233_v27  ;;  %v409_v59 = vadd.f32 1.0, %v1532_v45  ;;  %v329_v3 = vmul.f32 %v1995_v9, %v307_v41 }
  0xcc   :  { %v248_v54 = vsub.f32 %v216_v39, %v232_v29  ;;  %v1534_v56 = vpop.eup %1533  ;;  %1549 = vrsqrt.f32 %v278_v31  ;;  %v328_v60 = vmul.f32 %v1995_v9, %v306_v13  ;;  %v265_v13 = vsub.f32 %v1937_v52, %v2071_v15 }
  0xcd   :  { %v1536_v4 = vpop.eup %1535  ;;  %v281_v6 = vadd.f32 1e-05, %v249_v21  ;;  %1551 = vpow2.f32 %v386_v30  ;;  %v309_v37 = vmul.f32 %v1534_v56, %v261_v22  ;;  %v2100_v20 = vadd.f32 %v2002_v24, %v329_v3 }
  0xce   :  { %v280_v7 = vadd.f32 1e-05, %v248_v54  ;;  %1553 = vrcp.f32 %v409_v59  ;;  %v2097_v58 = vadd.f32 %v2002_v24, %v328_v60  ;;  %v308_v50 = vmul.f32 %v1536_v4, %v260_v2 }
  0xcf   :  { %1555 = vrsqrt.f32 %v281_v6  ;;  %v331_v8 = vmul.f32 %v1995_v9, %v309_v37  ;;  %v367_v19 = vsub.f32 0.0, %v2100_v20  ;;  %v264_v49 = vsub.f32 %v1942_v53, %v2073_v18 }
  0xd0   :  { %1557 = vrsqrt.f32 %v280_v7  ;;  %v366_v14 = vsub.f32 0.0, %v2097_v58  ;;  %v330_v1 = vmul.f32 %v1995_v9, %v308_v50 }
  0xd1   :  { %v1538_v10 = vpop.eup %1537  ;;  %1559 = vpow2.f32 %v388_v55  ;;  %v2107_v5 = vadd.f32 %v2002_v24, %v331_v8  ;;  %v392_v43 = vmul.f32 1.442695, %v367_v19 }
  0xd2   :  { %v1540_v11 = vpop.eup %1539  ;;  %v438_v33 = vmul.f32 %v1538_v10, %v2009_v34  ;;  %v390_v40 = vmul.f32 1.442695, %v366_v14  ;;  %v2111_v22 = vadd.f32 %v2002_v24, %v330_v1 }
  0xd3   :  { %v1542_v25 = vpop.eup %1541  ;;  %v410_v26 = vadd.f32 1.0, %v1540_v11  ;;  %v369_v27 = vsub.f32 0.0, %v2107_v5 }
  0xd4   :  { %v1544_v16 = vpop.eup %1543  ;;  %v439_v46 = vmul.f32 %v1542_v25, %v2012_v35  ;;  %1561 = vpow2.f32 %v390_v40  ;;  %v368_v28 = vsub.f32 0.0, %v2111_v22 }
  0xd5   :  { %v411_v29 = vadd.f32 1.0, %v1544_v16  ;;  %1563 = vrcp.f32 %v410_v26  ;;  %v396_v17 = vmul.f32 1.442695, %v369_v27  ;;  %v1546_v36 = vpop.eup %1545 }
  0xd6   :  { %v454_v47 = vpack.c.bf16 %v439_v46, %v438_v33  ;;  %1565 = vpow2.f32 %v392_v43  ;;  %v394_v34 = vmul.f32 1.442695, %v368_v28  ;;  %v440_v38 = vmul.f32 %v1546_v36, %v2029_v61 }
  0xd7   :  { %1567 = vrcp.f32 %v411_v29 }
  0xd8   :  { %v1548_v30 = vpop.eup %1547  ;;  %1446 = vmatprep.mubr.msk.bf16.mxu0 %vm72_vm0, %v454_v47  ;;  %1569 = vpow2.f32 %v394_v34 }
  0xd9   :  { %v1550_v35 = vpop.eup %1549  ;;  %1571 = vpow2.f32 %v396_v17  ;;  %v311_v12 = vmul.f32 %v1548_v30, %v263_v57 }
  0xda   :  { %v1552_v31 = vpop.eup %1551  ;;  %v310_v39 = vmul.f32 %v1550_v35, %v262_v0 }
  0xdb   :  { %v1554_v2 = vpop.eup %1553  ;;  %v412_v48 = vadd.f32 1.0, %v1552_v31  ;;  %v333_v51 = vmul.f32 %v1995_v9, %v311_v12 }
  0xdc   :  { %v1556_v41 = vpop.eup %1555  ;;  %v441_v63 = vmul.f32 %v1554_v2, %v2032_v62  ;;  %v332_v45 = vmul.f32 %v1995_v9, %v310_v39 }
  0xdd   :  { %v1558_v21 = vpop.eup %1557  ;;  %1573 = vrcp.f32 %v412_v48  ;;  %v2130_v61 = vadd.f32 %v2002_v24, %v333_v51  ;;  %v313_v54 = vmul.f32 %v1556_v41, %v265_v13 }
  0xde   :  { %v1560_v55 = vpop.eup %1559  ;;  %v455_v56 = vpack.c.bf16 %v441_v63, %v440_v38  ;;  %v2133_v52 = vadd.f32 %v2002_v24, %v332_v45  ;;  %v312_v15 = vmul.f32 %v1558_v21, %v264_v49 }
  0xdf   :  { %v413_v59 = vadd.f32 1.0, %v1560_v55  ;;  %v371_v60 = vsub.f32 0.0, %v2130_v61  ;;  %v335_v53 = vmul.f32 %v1995_v9, %v313_v54 }
  0xe0   :  { %1447 = vmatmul.mubr.msk.bf16.vlgmr.msra.gmra.mxu0 %vm72_vm0, %v455_v56  ;;  %v370_v62 = vsub.f32 0.0, %v2133_v52  ;;  %v334_v18 = vmul.f32 %v1995_v9, %v312_v15 }
  0xe1   :  { %v1562_v3 = vpop.eup %1561  ;;  %1575 = vrcp.f32 %v413_v59  ;;  %v400_v4 = vmul.f32 1.442695, %v371_v60  ;;  %v2141_v6 = vadd.f32 %v2002_v24, %v335_v53 }
  0xe2   :  { %v1564_v7 = vpop.eup %1563  ;;  %v414_v37 = vadd.f32 1.0, %v1562_v3  ;;  %v398_v50 = vmul.f32 1.442695, %v370_v62  ;;  %v2144_v8 = vadd.f32 %v2002_v24, %v334_v18 }
  0xe3   :  { %v1566_v14 = vpop.eup %1565  ;;  %v442_v19 = vmul.f32 %v1564_v7, %v2051_v42  ;;  %1577 = vpow2.f32 %v400_v4  ;;  %v373_v1 = vsub.f32 0.0, %v2141_v6 }
  0xe4   :  { %v1568_v10 = vpop.eup %1567  ;;  %v415_v9 = vadd.f32 1.0, %v1566_v14  ;;  %1579 = vrcp.f32 %v414_v37  ;;  %v372_v11 = vsub.f32 0.0, %v2144_v8 }
  0xe5   :  { %v1570_v33 = vpop.eup %1569  ;;  %v443_v40 = vmul.f32 %v1568_v10, %v2054_v44  ;;  %1581 = vpow2.f32 %v398_v50  ;;  %v404_v43 = vmul.f32 1.442695, %v373_v1 }
  0xe6   :  { %v1572_v25 = vpop.eup %1571  ;;  %1583 = vrcp.f32 %v415_v9  ;;  %v416_v24 = vadd.f32 1.0, %v1570_v33  ;;  %v402_v26 = vmul.f32 1.442695, %v372_v11 }
  0xe7   :  { %v456_v27 = vpack.c.bf16 %v443_v40, %v442_v19  ;;  %v417_v16 = vadd.f32 1.0, %v1572_v25  ;;  %1585 = vpow2.f32 %v404_v43 }
  0xe8   :  { %1587 = vrcp.f32 %v416_v24 }
  0xe9   :  { %1450 = vmatprep.mubr.msk.bf16.mxu0 %vm72_vm0, %v456_v27  ;;  %1589 = vrcp.f32 %v417_v16 }
  0xea   :  { %v1574_v42 = vpop.eup %1573  ;;  %1591 = vpow2.f32 %v402_v26 }
  0xeb   :  { %v444_v46 = vmul.f32 %v1574_v42, %v2077_v32 }
  0xee   :  { %v1576_v28 = vpop.eup %1575 }
  0xef   :  { %v445_v44 = vmul.f32 %v1576_v28, %v2084_v23 }
  0xf0   :  { %v1578_v29 = vpop.eup %1577 }
  0xf1   :  { %v1580_v17 = vpop.eup %1579  ;;  %v457_v47 = vpack.c.bf16 %v445_v44, %v444_v46  ;;  %v419_v34 = vadd.f32 1.0, %v1578_v29 }
  0xf2   :  { %v1582_v36 = vpop.eup %1581  ;;  %v446_v57 = vmul.f32 %v1580_v17, %v2097_v58 }
  0xf3   :  { %v1584_v30 = vpop.eup %1583  ;;  %1451 = vmatmul.mubr.msk.bf16.gmra.mxu0 %vm72_vm0, %v457_v47  ;;  %v418_v0 = vadd.f32 1.0, %v1582_v36  ;;  %1593 = vrcp.f32 %v419_v34 }
  0xf4   :  { %v1586_v35 = vpop.eup %1585  ;;  %v447_v12 = vmul.f32 %v1584_v30, %v2100_v20 }
  0xf5   :  { %v1588_v31 = vpop.eup %1587  ;;  %1595 = vrcp.f32 %v418_v0  ;;  %v421_v32 = vadd.f32 1.0, %v1586_v35 }
  0xf6   :  { %v1590_v38 = vpop.eup %1589  ;;  %v458_v23 = vpack.c.bf16 %v447_v12, %v446_v57  ;;  %v448_v39 = vmul.f32 %v1588_v31, %v2111_v22 }
  0xf7   :  { %v1592_v2 = vpop.eup %1591  ;;  %v449_v13 = vmul.f32 %v1590_v38, %v2107_v5  ;;  %1597 = vrcp.f32 %v421_v32 }
  0xf8   :  { %1454 = vmatprep.mubr.msk.bf16.mxu0 %vm72_vm0, %v458_v23  ;;  %v420_v58 = vadd.f32 1.0, %v1592_v2 }
  0xf9   :  { %v459_v48 = vpack.c.bf16 %v449_v13, %v448_v39 }
  0xfa   :  { %1599 = vrcp.f32 %v420_v58 }
  0xfb   :  { %1455 = vmatmul.mubr.msk.bf16.gmra.mxu0 %vm72_vm0, %v459_v48 }
 0x100   :  { %v1594_v51 = vpop.eup %1593 }
 0x101   :  { %v451_v20 = vmul.f32 %v1594_v51, %v2130_v61 }
 0x102   :  { %v1596_v41 = vpop.eup %1595 }
 0x103   :  { %v450_v49 = vmul.f32 %v1596_v41, %v2133_v52  ;;  %v2177_v52 = vld [vmem:[%s2700_s10] ss:$0 sm:$0xff] }
 0x104   :  { %v1598_v63 = vpop.eup %1597 }
 0x105   :  { %v460_v45 = vpack.c.bf16 %v451_v20, %v450_v49  ;;  %v453_v22 = vmul.f32 %v1598_v63, %v2141_v6 }
 0x107   :  { %v1600_v21 = vpop.eup %1599  ;;  %1458 = vmatprep.mubr.msk.bf16.mxu0 %vm72_vm0, %v460_v45 }
 0x108   :  { %v452_v5 = vmul.f32 %v1600_v21, %v2144_v8 }
 0x10a   :  { %v461_v54 = vpack.c.bf16 %v453_v22, %v452_v5 }
 0x10c   :  { %1459 = vmatmul.mubr.msk.bf16.gmra.mxu0 %vm72_vm0, %v461_v54 }
 0x1a0   :  { %v2166_v55 = vpop.f32.mrf.mxu0 }
 0x1a1   :  { %v2277_v21 = vadd.f32 %v2166_v55, %v2177_v52 }
 0x1a2   :  { %v2168_v56 = vpop.f32.mrf.mxu0 }
 0x1a4   :  { %v2170_v61 = vpop.f32.mrf.mxu0 }
 0x1a5   :  { %v2268_v49 = vadd.f32 %v2170_v61, %v2177_v52 }
 0x1a6   :  { %v2172_v15 = vpop.f32.mrf.mxu0 }
 0x1a7   :  { %v617_v5 = vsel %vm72_vm0, %v2268_v49, 0.0 }
 0x1b3   :  { %v1452_v59 = vpop.f32.mrf.mxu0 }
 0x1b4   :  { %v2180_v60 = vadd.f32 %v1452_v59, %v2177_v52  ;;  %v2286_v59 = vadd.f32 %v2177_v52, %v2172_v15 }
 0x1b5   :  { %v2182_v53 = vpop.f32.mrf.mxu0 }
 0x1b6   :  { %v626_v62 = vsel %vm72_vm0, %v2180_v60, 0.0  ;;  %v2259_v48 = vadd.f32 %v2177_v52, %v2182_v53  ;;  %v678_v22 = vmul.f32 %v2180_v60, %v2180_v60  ;;  %v614_v53 = vsel %vm72_vm0, %v2277_v21, 0.0 }
 0x1b7   :  { %627 = vadd.xlane.f32.xlu1 %v626_v62  ;;  %v1453_v18 = vpop.f32.mrf.mxu0 }
 0x1b8   :  { %v2187_v3 = vadd.f32 %v1453_v18, %v2177_v52  ;;  %v620_v63 = vsel %vm72_vm0, %v2259_v48, 0.0  ;;  %v706_v54 = vsel %vm72_vm0, %v678_v22, 0.0  ;;  %v676_v62 = vmul.f32 %v2259_v48, %v2259_v48 }
 0x1b9   :  { %v562_v4 = vpop.f32.mrf.mxu0  ;;  %v2295_v18 = vadd.f32 %v2177_v52, %v2168_v56 }
 0x1ba   :  { %v629_v6 = vsel %vm72_vm0, %v2187_v3, 0.0  ;;  %v679_v7 = vmul.f32 %v2187_v3, %v2187_v3  ;;  %v2250_v39 = vadd.f32 %v2177_v52, %v562_v4  ;;  %v611_v4 = vsel %vm72_vm0, %v2286_v59, 0.0 }
 0x1bb   :  { %630 = vadd.xlane.f32.xlu1 %v629_v6  ;;  %v1456_v37 = vpop.f32.mrf.mxu0  ;;  %v700_v15 = vsel %vm72_vm0, %v676_v62, 0.0  ;;  %v675_v6 = vmul.f32 %v2268_v49, %v2268_v49 }
 0x1bc   :  { %v709_v50 = vsel %vm72_vm0, %v679_v7, 0.0  ;;  %v2195_v8 = vadd.f32 %v1456_v37, %v2177_v52  ;;  %v623_v51 = vsel %vm72_vm0, %v2250_v39, 0.0  ;;  %v677_v61 = vmul.f32 %v2250_v39, %v2250_v39 }
 0x1bd   :  { %710 = vadd.xlane.f32.xlu0 %v709_v50  ;;  %v575_v14 = vpop.f32.mrf.mxu0  ;;  %v608_v7 = vsel %vm72_vm0, %v2295_v18, 0.0  ;;  %v672_v37 = vmul.f32 %v2295_v18, %v2295_v18  ;;  %v697_v56 = vsel %vm72_vm0, %v675_v6, 0.0 }
 0x1be   :  { %v2198_v19 = vadd.f32 %v2177_v52, %v575_v14  ;;  %v638_v1 = vsel %vm72_vm0, %v2195_v8, 0.0  ;;  %v682_v10 = vmul.f32 %v2195_v8, %v2195_v8  ;;  %v703_v55 = vsel %vm72_vm0, %v677_v61, 0.0 }
 0x1bf   :  { %639 = vadd.xlane.f32.xlu1 %v638_v1  ;;  %v1457_v9 = vpop.f32.mrf.mxu0  ;;  %v688_v50 = vsel %vm72_vm0, %v672_v37, 0.0  ;;  %v673_v1 = vmul.f32 %v2286_v59, %v2286_v59 }
 0x1c0   :  { %v2205_v11 = vadd.f32 %v1457_v9, %v2177_v52  ;;  %v718_v33 = vsel %vm72_vm0, %v682_v10, 0.0  ;;  %v680_v40 = vmul.f32 %v2198_v19, %v2198_v19  ;;  %v632_v25 = vsel %vm72_vm0, %v2198_v19, 0.0 }
 0x1c1   :  { %719 = vadd.xlane.f32.xlu0 %v718_v33  ;;  %v578_v43 = vpop.f32.mrf.mxu0  ;;  %v691_v10 = vsel %vm72_vm0, %v673_v1, 0.0 }
 0x1c2   :  { %v2213_v24 = vadd.f32 %v2177_v52, %v578_v43  ;;  %v712_v26 = vsel %vm72_vm0, %v680_v40, 0.0  ;;  %v683_v27 = vmul.f32 %v2205_v11, %v2205_v11  ;;  %v641_v16 = vsel %vm72_vm0, %v2205_v11, 0.0 }
 0x1c3   :  { %633 = vadd.xlane.f32.xlu1 %v632_v25 }
 0x1c4   :  { %v721_v42 = vsel %vm72_vm0, %v683_v27, 0.0  ;;  %v681_v46 = vmul.f32 %v2213_v24, %v2213_v24  ;;  %v635_v28 = vsel %vm72_vm0, %v2213_v24, 0.0  ;;  %v1721_v27 = vmov 0  }
 0x1c5   :  { %713 = vadd.xlane.f32.xlu0 %v712_v26  ;;  %1502 = vset.pattern.permute.xlu1 %v1721_v27 }
 0x1c6   :  { %v715_v29 = vsel %vm72_vm0, %v681_v46, 0.0  ;;  %1501 = vset.pattern.permute.xlu0 %v1721_v27  ;;  %v2335_v27 = vld [vmem:[%s2701_s11] ss:$0 sm:$0xff]  ;;  %s1373_s11 = sshll.u32 %s1724_s21, 4  ;;  %s1374_s11 = int_to_ptr.vmem [resolvable:$true] %s1373_s11 }
 0x1c7   :  { %642 = vadd.xlane.f32.xlu1 %v641_v16  ;;  %p1704_p1 = scmp.lt.s32.totalorder %s1374_s11, %s1374_s11 }
 0x1c9   :  { %722 = vadd.xlane.f32.xlu0 %v721_v42 }
 0x1cb   :  { %636 = vadd.xlane.f32.xlu1 %v635_v28 }
 0x1cc   :  { %v1460_v44 = vpop.f32.mrf.mxu0 }
 0x1cd   :  { %v2227_v17 = vadd.f32 %v1460_v44, %v2177_v52  ;;  %716 = vadd.xlane.f32.xlu0 %v715_v29 }
 0x1ce   :  { %v591_v47 = vpop.f32.mrf.mxu0 }
 0x1cf   :  { %v2230_v34 = vadd.f32 %v2177_v52, %v591_v47  ;;  %v650_v36 = vsel %vm72_vm0, %v2227_v17, 0.0  ;;  %v686_v57 = vmul.f32 %v2227_v17, %v2227_v17 }
 0x1d0   :  { %651 = vadd.xlane.f32.xlu1 %v650_v36  ;;  %v1461_v30 = vpop.f32.mrf.mxu0 }
 0x1d1   :  { %v2237_v0 = vadd.f32 %v1461_v30, %v2177_v52  ;;  %v730_v35 = vsel %vm72_vm0, %v686_v57, 0.0  ;;  %v644_v32 = vsel %vm72_vm0, %v2230_v34, 0.0  ;;  %v684_v23 = vmul.f32 %v2230_v34, %v2230_v34 }
 0x1d2   :  { %731 = vadd.xlane.f32.xlu0 %v730_v35  ;;  %v594_v12 = vpop.f32.mrf.mxu0 }
 0x1d3   :  { %v2241_v31 = vadd.f32 %v2177_v52, %v594_v12  ;;  %v653_v38 = vsel %vm72_vm0, %v2237_v0, 0.0  ;;  %v724_v13 = vsel %vm72_vm0, %v684_v23, 0.0  ;;  %v687_v58 = vmul.f32 %v2237_v0, %v2237_v0 }
 0x1d4   :  { %645 = vadd.xlane.f32.xlu1 %v644_v32  ;;  %v674_v52 = vmul.f32 %v2277_v21, %v2277_v21 }
 0x1d5   :  { %v647_v2 = vsel %vm72_vm0, %v2241_v31, 0.0  ;;  %v733_v20 = vsel %vm72_vm0, %v687_v58, 0.0  ;;  %v685_v41 = vmul.f32 %v2241_v31, %v2241_v31 }
 0x1d6   :  { %654 = vadd.xlane.f32.xlu0 %v653_v38  ;;  %v694_v14 = vsel %vm72_vm0, %v674_v52, 0.0 }
 0x1d7   :  { %v727_v45 = vsel %vm72_vm0, %v685_v41, 0.0 }
 0x1d8   :  { %648 = vadd.xlane.f32.xlu1 %v647_v2 }
 0x1da   :  { %725 = vadd.xlane.f32.xlu0 %v724_v13 }
 0x1dc   :  { %624 = vadd.xlane.f32.xlu1 %v623_v51 }
 0x1de   :  { %734 = vadd.xlane.f32.xlu0 %v733_v20 }
 0x1e0   :  { %621 = vadd.xlane.f32.xlu1 %v620_v63 }
 0x1e2   :  { %728 = vadd.xlane.f32.xlu0 %v727_v45 }
 0x1e4   :  { %618 = vadd.xlane.f32.xlu1 %v617_v5 }
 0x1e6   :  { %707 = vadd.xlane.f32.xlu0 %v706_v54 }
 0x1e8   :  { %615 = vadd.xlane.f32.xlu1 %v614_v53 }
 0x1ea   :  { %704 = vadd.xlane.f32.xlu0 %v703_v55 }
 0x1ec   :  { %612 = vadd.xlane.f32.xlu1 %v611_v4 }
 0x1ee   :  { %701 = vadd.xlane.f32.xlu0 %v700_v15 }
 0x1f0   :  { %609 = vadd.xlane.f32.xlu1 %v608_v7 }
 0x1f2   :  { %698 = vadd.xlane.f32.xlu0 %v697_v56 }
 0x1f4   :  { %689 = vadd.xlane.f32.xlu1 %v688_v50 }
 0x1f6   :  { %695 = vadd.xlane.f32.xlu0 %v694_v14 }
 0x1fa   :  { %692 = vadd.xlane.f32.xlu0 %v691_v10 }
 0x240   :  { %v2314_v9 = vpop.xlane.xlu1 %627 }
 0x244   :  { %v631_v33 = vpop.xlane.xlu1 %630 }
 0x245   :  { %v663_v40 = vmul.f32 0.03125, %v631_v33 }
 0x246   :  { %v711_v43 = vpop.xlane.xlu0 %710 }
 0x247   :  { %v759_v25 = vmul.f32 %v663_v40, %v663_v40  ;;  %v743_v26 = vmul.f32 0.03125, %v711_v43  ;;  %v791_v10 = vsub.f32 %v2187_v3, %v663_v40  ;;  %v2341_v3 = vld [vmem:[%s2702_s12] ss:$0 sm:$0xff] }
 0x248   :  { %v640_v16 = vpop.xlane.xlu1 %639 }
 0x249   :  { %v775_v42 = vsub.f32 %v743_v26, %v759_v25  ;;  %v666_v46 = vmul.f32 0.03125, %v640_v16 }
 0x24a   :  { %v720_v28 = vpop.xlane.xlu0 %719 }
 0x24b   :  { %v762_v44 = vmul.f32 %v666_v46, %v666_v46  ;;  %v746_v29 = vmul.f32 0.03125, %v720_v28  ;;  %v807_v47 = vadd.f32 1e-05, %v775_v42  ;;  %v794_v52 = vsub.f32 %v2195_v8, %v666_v46 }
 0x24c   :  { %v634_v36 = vpop.xlane.xlu1 %633 }
 0x24d   :  { %v778_v57 = vsub.f32 %v746_v29, %v762_v44  ;;  %v2316_v30 = vmul.f32 0.03125, %v634_v36  ;;  %1601 = vrsqrt.f32 %v807_v47 }
 0x24e   :  { %v714_v35 = vpop.xlane.xlu0 %713 }
 0x24f   :  { %v810_v12 = vadd.f32 1e-05, %v778_v57  ;;  %v760_v32 = vmul.f32 %v2316_v30, %v2316_v30  ;;  %v744_v38 = vmul.f32 0.03125, %v714_v35  ;;  %v792_v36 = vsub.f32 %v2198_v19, %v2316_v30 }
 0x250   :  { %v643_v23 = vpop.xlane.xlu1 %642 }
 0x251   :  { %1603 = vrsqrt.f32 %v810_v12  ;;  %v776_v2 = vsub.f32 %v744_v38, %v760_v32  ;;  %v667_v13 = vmul.f32 0.03125, %v643_v23 }
 0x252   :  { %v723_v58 = vpop.xlane.xlu0 %722 }
 0x253   :  { %v808_v51 = vadd.f32 1e-05, %v776_v2  ;;  %v763_v20 = vmul.f32 %v667_v13, %v667_v13  ;;  %v747_v41 = vmul.f32 0.03125, %v723_v58  ;;  %v795_v57 = vsub.f32 %v2205_v11, %v667_v13 }
 0x254   :  { %v637_v63 = vpop.xlane.xlu1 %636 }
 0x255   :  { %v779_v45 = vsub.f32 %v747_v41, %v763_v20  ;;  %v2320_v22 = vmul.f32 0.03125, %v637_v63  ;;  %1605 = vrsqrt.f32 %v808_v51 }
 0x256   :  { %v717_v5 = vpop.xlane.xlu0 %716 }
 0x257   :  { %v811_v54 = vadd.f32 1e-05, %v779_v45  ;;  %v761_v61 = vmul.f32 %v2320_v22, %v2320_v22  ;;  %v745_v53 = vmul.f32 0.03125, %v717_v5 }
 0x259   :  { %1607 = vrsqrt.f32 %v811_v54  ;;  %v777_v55 = vsub.f32 %v745_v53, %v761_v61  ;;  %v652_v62 = vpop.xlane.xlu1 %651  ;;  %v2364_v54 = vmul.f32 0.03125, %v2314_v9  ;;  %v793_v9 = vsub.f32 %v2213_v24, %v2320_v22 }
 0x25a   :  { %v2324_v4 = vmul.f32 0.03125, %v652_v62  ;;  %v1602_v56 = vpop.eup %1601 }
 0x25b   :  { %v732_v15 = vpop.xlane.xlu0 %731  ;;  %v809_v6 = vadd.f32 1e-05, %v777_v55  ;;  %v839_v8 = vmul.f32 %v1602_v56, %v791_v10 }
 0x25c   :  { %v766_v7 = vmul.f32 %v2324_v4, %v2324_v4  ;;  %v750_v37 = vmul.f32 0.03125, %v732_v15  ;;  %v798_v10 = vsub.f32 %v2227_v17, %v2324_v4 }
 0x25d   :  { %v646_v50 = vpop.xlane.xlu1 %645  ;;  %1609 = vrsqrt.f32 %v809_v6  ;;  %v861_v32 = vmul.f32 %v2335_v27, %v839_v8 }
 0x25e   :  { %v1604_v14 = vpop.eup %1603  ;;  %v782_v1 = vsub.f32 %v750_v37, %v766_v7  ;;  %v2330_v26 = vmul.f32 0.03125, %v646_v50 }
 0x25f   :  { %v655_v33 = vpop.xlane.xlu0 %654  ;;  %v842_v43 = vmul.f32 %v1604_v14, %v794_v52  ;;  %v2361_v13 = vadd.f32 %v2341_v3, %v861_v32 }
 0x260   :  { %v814_v25 = vadd.f32 1e-05, %v782_v1  ;;  %v764_v44 = vmul.f32 %v2330_v26, %v2330_v26  ;;  %v2348_v29 = vmul.f32 0.03125, %v655_v33  ;;  %v758_v1 = vmul.f32 %v2364_v54, %v2364_v54 }
 0x261   :  { %v649_v16 = vpop.xlane.xlu1 %648  ;;  %v864_v42 = vmul.f32 %v2335_v27, %v842_v43  ;;  %v899_v52 = vsub.f32 0.0, %v2361_v13 }
 0x262   :  { %1611 = vrsqrt.f32 %v814_v25  ;;  %v1606_v28 = vpop.eup %1605  ;;  %v767_v41 = vmul.f32 %v2348_v29, %v2348_v29  ;;  %v2357_v63 = vmul.f32 0.03125, %v649_v16 }
 0x263   :  { %v726_v40 = vpop.xlane.xlu0 %725  ;;  %v2344_v46 = vadd.f32 %v2341_v3, %v864_v42  ;;  %v840_v20 = vmul.f32 %v1606_v28, %v792_v36  ;;  %v922_v28 = vmul.f32 1.442695, %v899_v52 }
 0x264   :  { %v748_v47 = vmul.f32 0.03125, %v726_v40  ;;  %v765_v62 = vmul.f32 %v2357_v63, %v2357_v63 }
 0x265   :  { %v625_v35 = vpop.xlane.xlu1 %624  ;;  %v902_v12 = vsub.f32 0.0, %v2344_v46  ;;  %v862_v55 = vmul.f32 %v2335_v27, %v840_v20 }
 0x266   :  { %v1608_v38 = vpop.eup %1607  ;;  %v780_v23 = vsub.f32 %v748_v47, %v764_v44  ;;  %v2383_v16 = vmul.f32 0.03125, %v625_v35 }
 0x267   :  { %v735_v2 = vpop.xlane.xlu0 %734  ;;  %v928_v58 = vmul.f32 1.442695, %v902_v12  ;;  %v843_v51 = vmul.f32 %v1608_v38, %v795_v57  ;;  %v2381_v25 = vadd.f32 %v2341_v3, %v862_v55 }
 0x268   :  { %v812_v45 = vadd.f32 1e-05, %v780_v23  ;;  %v751_v19 = vmul.f32 0.03125, %v735_v2  ;;  %v757_v57 = vmul.f32 %v2383_v16, %v2383_v16 }
 0x269   :  { %v622_v30 = vpop.xlane.xlu1 %621  ;;  %1613 = vpow2.f32 %v928_v58  ;;  %v865_v11 = vmul.f32 %v2335_v27, %v843_v51  ;;  %v900_v4 = vsub.f32 0.0, %v2381_v25  ;;  %v796_v58 = vsub.f32 %v2230_v34, %v2330_v26 }
 0x26a   :  { %1615 = vrsqrt.f32 %v812_v45  ;;  %v783_v5 = vsub.f32 %v751_v19, %v767_v41  ;;  %v1610_v7 = vpop.eup %1609  ;;  %v2385_v47 = vmul.f32 0.03125, %v622_v30 }
 0x26b   :  { %v729_v61 = vpop.xlane.xlu0 %728  ;;  %v2367_v53 = vadd.f32 %v2341_v3, %v865_v11  ;;  %v841_v40 = vmul.f32 %v1610_v7, %v793_v9  ;;  %v924_v11 = vmul.f32 1.442695, %v900_v4  ;;  %v797_v9 = vsub.f32 %v2241_v31, %v2357_v63 }
 0x26c   :  { %v815_v15 = vadd.f32 1e-05, %v783_v5  ;;  %v749_v6 = vmul.f32 0.03125, %v729_v61  ;;  %v756_v41 = vmul.f32 %v2385_v47, %v2385_v47 }
 0x26d   :  { %v619_v37 = vpop.xlane.xlu1 %618  ;;  %v903_v56 = vsub.f32 0.0, %v2367_v53  ;;  %v863_v32 = vmul.f32 %v2335_v27, %v841_v40 }
 0x26e   :  { %1617 = vrsqrt.f32 %v815_v15  ;;  %v781_v50 = vsub.f32 %v749_v6, %v765_v62  ;;  %v2400_v5 = vmul.f32 0.03125, %v619_v37  ;;  %v799_v37 = vsub.f32 %v2237_v0, %v2348_v29 }
 0x26f   :  { %v1612_v14 = vpop.eup %1611  ;;  %v708_v33 = vpop.xlane.xlu0 %707  ;;  %v930_v43 = vmul.f32 1.442695, %v903_v56  ;;  %v2403_v62 = vadd.f32 %v2341_v3, %v863_v32 }
 0x270   :  { %v813_v42 = vadd.f32 1e-05, %v781_v50  ;;  %v742_v8 = vmul.f32 0.03125, %v708_v33  ;;  %v846_v22 = vmul.f32 %v1612_v14, %v798_v10 }
 0x271   :  { %v616_v24 = vpop.xlane.xlu1 %615  ;;  %1619 = vpow2.f32 %v930_v43  ;;  %v901_v31 = vsub.f32 0.0, %v2403_v62 }
 0x272   :  { %1621 = vrsqrt.f32 %v813_v42  ;;  %v774_v44 = vsub.f32 %v742_v8, %v758_v1  ;;  %v868_v17 = vmul.f32 %v2335_v27, %v846_v22  ;;  %v2405_v15 = vmul.f32 0.03125, %v616_v24 }
 0x273   :  { %v705_v36 = vpop.xlane.xlu0 %704  ;;  %1623 = vpow2.f32 %v922_v28  ;;  %v755_v1 = vmul.f32 %v2400_v5, %v2400_v5 }
 0x274   :  { %v806_v35 = vadd.f32 1e-05, %v774_v44  ;;  %v741_v12 = vmul.f32 0.03125, %v705_v36  ;;  %v2393_v23 = vadd.f32 %v2341_v3, %v868_v17  ;;  %v754_v43 = vmul.f32 %v2405_v15, %v2405_v15 }
 0x275   :  { %v613_v38 = vpop.xlane.xlu1 %612 }
 0x276   :  { %v1614_v2 = vpop.eup %1613  ;;  %1625 = vrsqrt.f32 %v806_v35  ;;  %v773_v51 = vsub.f32 %v741_v12, %v757_v57  ;;  %v906_v30 = vsub.f32 0.0, %v2393_v23  ;;  %v2424_v28 = vmul.f32 0.03125, %v613_v38 }
 0x277   :  { %v1616_v20 = vpop.eup %1615  ;;  %v702_v45 = vpop.xlane.xlu0 %701  ;;  %v950_v19 = vadd.f32 1.0, %v1614_v2 }
 0x278   :  { %v805_v61 = vadd.f32 1e-05, %v773_v51  ;;  %v740_v55 = vmul.f32 0.03125, %v702_v45  ;;  %v936_v26 = vmul.f32 1.442695, %v906_v30  ;;  %v844_v6 = vmul.f32 %v1616_v20, %v796_v58 }
 0x279   :  { %v610_v34 = vpop.xlane.xlu1 %609  ;;  %1627 = vrcp.f32 %v950_v19  ;;  %v926_v51 = vmul.f32 1.442695, %v901_v31  ;;  %v790_v30 = vsub.f32 %v2180_v60, %v2364_v54  ;;  %v789_v60 = vsub.f32 %v2250_v39, %v2383_v16 }
 0x27a   :  { %1629 = vrsqrt.f32 %v805_v61  ;;  %v772_v7 = vsub.f32 %v740_v55, %v756_v41  ;;  %v2407_v56 = vmul.f32 0.03125, %v610_v34  ;;  %v866_v14 = vmul.f32 %v2335_v27, %v844_v6 }
 0x27b   :  { %v1618_v52 = vpop.eup %1617  ;;  %v699_v50 = vpop.xlane.xlu0 %698  ;;  %1631 = vpow2.f32 %v936_v26 }
 0x27c   :  { %v804_v10 = vadd.f32 1e-05, %v772_v7  ;;  %v739_v33 = vmul.f32 0.03125, %v699_v50  ;;  %1633 = vpow2.f32 %v924_v11  ;;  %v2419_v8 = vadd.f32 %v2341_v3, %v866_v14 }
 0x27d   :  { %v690_v42 = vpop.xlane.xlu1 %689  ;;  %v847_v0 = vmul.f32 %v1618_v52, %v799_v37  ;;  %v752_v63 = vmul.f32 %v2407_v56, %v2407_v56  ;;  %v753_v11 = vmul.f32 %v2424_v28, %v2424_v28 }
 0x27e   :  { %v1620_v29 = vpop.eup %1619  ;;  %1635 = vrsqrt.f32 %v804_v10  ;;  %v771_v40 = vsub.f32 %v739_v33, %v755_v1  ;;  %v736_v24 = vmul.f32 0.03125, %v690_v42  ;;  %v904_v17 = vsub.f32 0.0, %v2419_v8 }
 0x27f   :  { %v1622_v22 = vpop.eup %1621  ;;  %v696_v44 = vpop.xlane.xlu0 %695  ;;  %v951_v36 = vadd.f32 1.0, %v1620_v29  ;;  %v869_v4 = vmul.f32 %v2335_v27, %v847_v0 }
 0x280   :  { %v803_v57 = vadd.f32 1e-05, %v771_v40  ;;  %v768_v35 = vsub.f32 %v736_v24, %v752_v63  ;;  %v738_v12 = vmul.f32 0.03125, %v696_v44  ;;  %v845_v32 = vmul.f32 %v1622_v22, %v797_v9  ;;  %v2431_v20 = vpop.eup %1623 }
 0x281   :  { %1637 = vrcp.f32 %v951_v36  ;;  %v932_v2 = vmul.f32 1.442695, %v904_v17  ;;  %v2429_v58 = vadd.f32 %v2341_v3, %v869_v4 }
 0x282   :  { %1639 = vrsqrt.f32 %v803_v57  ;;  %v800_v38 = vadd.f32 1e-05, %v768_v35  ;;  %v770_v41 = vsub.f32 %v738_v12, %v754_v43  ;;  %v867_v45 = vmul.f32 %v2335_v27, %v845_v32  ;;  %v2450_v43 = vld [vmem:[%s2703_s13] ss:$0 sm:$0xff] }
 0x283   :  { %v1626_v19 = vpop.eup %1625  ;;  %v693_v61 = vpop.xlane.xlu0 %692  ;;  %1641 = vpow2.f32 %v932_v2  ;;  %v907_v55 = vsub.f32 0.0, %v2429_v58 }
 0x284   :  { %1643 = vrsqrt.f32 %v800_v38  ;;  %v802_v34 = vadd.f32 1e-05, %v770_v41  ;;  %v737_v26 = vmul.f32 0.03125, %v693_v61  ;;  %v2440_v6 = vadd.f32 %v2341_v3, %v867_v45 }
 0x285   :  { %v938_v7 = vmul.f32 1.442695, %v907_v55  ;;  %1645 = vpow2.f32 %v926_v51  ;;  %v838_v52 = vmul.f32 %v1626_v19, %v790_v30  ;;  %v784_v51 = vsub.f32 %v2295_v18, %v2407_v56 }
 0x286   :  { %v1628_v37 = vpop.eup %1627  ;;  %1647 = vrsqrt.f32 %v802_v34  ;;  %v769_v54 = vsub.f32 %v737_v26, %v753_v11  ;;  %v905_v9 = vsub.f32 0.0, %v2440_v6 }
 0x287   :  { %v1630_v50 = vpop.eup %1629  ;;  %v982_v14 = vmul.f32 %v1628_v37, %v2344_v46  ;;  %1649 = vpow2.f32 %v938_v7  ;;  %v860_v1 = vmul.f32 %v2335_v27, %v838_v52  ;;  %v788_v46 = vsub.f32 %v2259_v48, %v2385_v47 }
 0x288   :  { %v1632_v10 = vpop.eup %1631  ;;  %v801_v33 = vadd.f32 1e-05, %v769_v54  ;;  %v934_v42 = vmul.f32 1.442695, %v905_v9  ;;  %v837_v0 = vmul.f32 %v1630_v50, %v789_v60  ;;  %v787_v48 = vsub.f32 %v2268_v49, %v2400_v5 }
 0x289   :  { %v1634_v39 = vpop.eup %1633  ;;  %v1005_v16 = vmul.f32 %v2450_v43, %v982_v14  ;;  %v954_v31 = vadd.f32 1.0, %v1632_v10  ;;  %v2454_v29 = vadd.f32 %v2341_v3, %v860_v1  ;;  %v786_v49 = vsub.f32 %v2277_v21, %v2405_v15 }
 0x28a   :  { %1651 = vrsqrt.f32 %v801_v33  ;;  %v859_v63 = vmul.f32 %v2335_v27, %v837_v0  ;;  %v948_v17 = vadd.f32 1.0, %v1634_v39  ;;  %v785_v52 = vsub.f32 %v2286_v59, %v2424_v28 }
 0x28b   :  { %v1636_v40 = vpop.eup %1635  ;;  %v1041_v24 = vsel %vm72_vm0, %v1005_v16, 0.0  ;;  %1653 = vrcp.f32 %v954_v31  ;;  %v898_v22 = vsub.f32 0.0, %v2454_v29  ;;  %v947_v1 = vadd.f32 1.0, %v2431_v20 }
 0x28c   :  { %1042 = vadd.xlane.f32.xlu1 %v1041_v24  ;;  %1655 = vpow2.f32 %v934_v42  ;;  %v2462_v44 = vadd.f32 %v2341_v3, %v859_v63  ;;  %v836_v36 = vmul.f32 %v1636_v40, %v788_v46 }
 0x28d   :  { %v920_v4 = vmul.f32 1.442695, %v898_v22 }
 0x28e   :  { %v1638_v57 = vpop.eup %1637  ;;  %v897_v47 = vsub.f32 0.0, %v2462_v44  ;;  %v858_v35 = vmul.f32 %v2335_v27, %v836_v36 }
 0x28f   :  { %v1640_v12 = vpop.eup %1639  ;;  %v983_v32 = vmul.f32 %v1638_v57, %v2367_v53  ;;  %1657 = vpow2.f32 %v920_v4 }
 0x290   :  { %v1642_v2 = vpop.eup %1641  ;;  %v918_v38 = vmul.f32 1.442695, %v897_v47  ;;  %v2472_v41 = vadd.f32 %v2341_v3, %v858_v35  ;;  %v835_v45 = vmul.f32 %v1640_v12, %v787_v48  ;;  %1659 = vrcp.f32 %v948_v17 }
 0x291   :  { %v1644_v19 = vpop.eup %1643  ;;  %v1006_v5 = vmul.f32 %v2450_v43, %v983_v32  ;;  %v952_v30 = vadd.f32 1.0, %v1642_v2 }
 0x292   :  { %v1646_v11 = vpop.eup %1645  ;;  %1661 = vpow2.f32 %v918_v38  ;;  %v896_v53 = vsub.f32 0.0, %v2472_v41  ;;  %v857_v61 = vmul.f32 %v2335_v27, %v835_v45  ;;  %v832_v18 = vmul.f32 %v1644_v19, %v784_v51 }
 0x293   :  { %v1648_v56 = vpop.eup %1647  ;;  %v1044_v55 = vsel %vm72_vm0, %v1006_v5, 0.0  ;;  %1663 = vrcp.f32 %v952_v30  ;;  %v949_v60 = vadd.f32 1.0, %v1646_v11 }
 0x294   :  { %v1650_v34 = vpop.eup %1649  ;;  %1045 = vadd.xlane.f32.xlu0 %v1044_v55  ;;  %v916_v26 = vmul.f32 1.442695, %v896_v53  ;;  %v2481_v21 = vadd.f32 %v2341_v3, %v857_v61  ;;  %v834_v15 = vmul.f32 %v1648_v56, %v786_v49  ;;  %v854_v7 = vmul.f32 %v2335_v27, %v832_v18 }
 0x295   :  { %v955_v37 = vadd.f32 1.0, %v1650_v34 }
 0x296   :  { %1665 = vpow2.f32 %v916_v26  ;;  %v895_v54 = vsub.f32 0.0, %v2481_v21  ;;  %v856_v9 = vmul.f32 %v2335_v27, %v834_v15  ;;  %v2489_v50 = vadd.f32 %v2341_v3, %v854_v7 }
 0x297   :  { %v1652_v14 = vpop.eup %1651  ;;  %1667 = vrcp.f32 %v955_v37 }
 0x298   :  { %v1654_v10 = vpop.eup %1653  ;;  %v914_v33 = vmul.f32 1.442695, %v895_v54  ;;  %v2493_v42 = vadd.f32 %v2341_v3, %v856_v9  ;;  %v892_v59 = vsub.f32 0.0, %v2489_v50  ;;  %v833_v28 = vmul.f32 %v1652_v14, %v785_v52 }
 0x299   :  { %v1656_v0 = vpop.eup %1655  ;;  %v986_v39 = vmul.f32 %v1654_v10, %v2393_v23  ;;  %1669 = vrcp.f32 %v949_v60 }
 0x29a   :  { %v953_v16 = vadd.f32 1.0, %v1656_v0  ;;  %1671 = vpow2.f32 %v914_v33  ;;  %v894_v31 = vsub.f32 0.0, %v2493_v42  ;;  %v908_v46 = vmul.f32 1.442695, %v892_v59 }
 0x29b   :  { %v1009_v63 = vmul.f32 %v2450_v43, %v986_v39  ;;  %1673 = vrcp.f32 %v947_v1  ;;  %v855_v20 = vmul.f32 %v2335_v27, %v833_v28 }
 0x29c   :  { %v1658_v40 = vpop.eup %1657  ;;  %1675 = vrcp.f32 %v953_v16  ;;  %v912_v24 = vmul.f32 1.442695, %v894_v31 }
 0x29d   :  { %v1053_v22 = vsel %vm72_vm0, %v1009_v63, 0.0  ;;  %v946_v36 = vadd.f32 1.0, %v1658_v40  ;;  %1677 = vpow2.f32 %v908_v46  ;;  %v2502_v23 = vadd.f32 %v2341_v3, %v855_v20  ;;  %v1660_v17 = vpop.eup %1659 }
 0x29e   :  { %1054 = vadd.xlane.f32.xlu1 %v1053_v22  ;;  %1679 = vpow2.f32 %v912_v24  ;;  %v980_v35 = vmul.f32 %v1660_v17, %v2381_v25 }
 0x29f   :  { %v1662_v4 = vpop.eup %1661  ;;  %1681 = vrcp.f32 %v946_v36  ;;  %v893_v57 = vsub.f32 0.0, %v2502_v23 }
 0x2a0   :  { %v1664_v48 = vpop.eup %1663  ;;  %v945_v47 = vadd.f32 1.0, %v1662_v4  ;;  %v1003_v45 = vmul.f32 %v2450_v43, %v980_v35  ;;  %v1104_v35 = vld [vmem:[%s2693_s3 + $0x58] sm:$0xff] }
 0x2a1   :  { %v984_v27 = vmul.f32 %v1664_v48, %v2419_v8  ;;  %v910_v12 = vmul.f32 1.442695, %v893_v57 }
 0x2a2   :  { %1683 = vrcp.f32 %v945_v47  ;;  %v1035_v53 = vsel %vm72_vm0, %v1003_v45, 0.0 }
 0x2a3   :  { %v1666_v32 = vpop.eup %1665  ;;  %v1007_v2 = vmul.f32 %v2450_v43, %v984_v27  ;;  %1685 = vpow2.f32 %v910_v12  ;;  %v1106_v27 = vld [vmem:[%s2693_s3 + $0x68] sm:$0xff]  ;;  %v1103_v12 = vld [vmem:[%s2693_s3 + $0x50] sm:$0xff] }
 0x2a4   :  { %v1668_v3 = vpop.eup %1667  ;;  %v944_v51 = vadd.f32 1.0, %v1666_v32  ;;  %v1102_v32 = vld [vmem:[%s2693_s3 + $0x48] sm:$0xff] }
 0x2a5   :  { %v1047_v38 = vsel %vm72_vm0, %v1007_v2, 0.0  ;;  %v987_v19 = vmul.f32 %v1668_v3, %v2429_v58  ;;  %v1101_v2 = vld [vmem:[%s2693_s3 + $0x40] sm:$0xff]  ;;  %v1100_v3 = vld [vmem:[%s2693_s3 + $0x38] sm:$0xff] }
 0x2a6   :  { %v1670_v49 = vpop.eup %1669  ;;  %1048 = vadd.xlane.f32.xlu1 %v1047_v38  ;;  %1687 = vrcp.f32 %v944_v51  ;;  %v1073_v38 = vld [vmem:[%s2692_s2 + $0x70] sm:$0xff] }
 0x2a7   :  { %v1672_v8 = vpop.eup %1671  ;;  %v1010_v25 = vmul.f32 %v2450_v43, %v987_v19  ;;  %v981_v58 = vmul.f32 %v1670_v49, %v2403_v62  ;;  %v1071_v49 = vld [vmem:[%s2692_s2 + $0x60] sm:$0xff] }
 0x2a8   :  { %v1674_v5 = vpop.eup %1673  ;;  %v943_v30 = vadd.f32 1.0, %v1672_v8  ;;  %v1722_v8 = vmov 0.0  }
 0x2a9   :  { %v1676_v11 = vpop.eup %1675  ;;  %v1056_v61 = vsel %vm72_vm0, %v1010_v25, 0.0  ;;  %v1004_v60 = vmul.f32 %v2450_v43, %v981_v58  ;;  %v979_v54 = vmul.f32 %v1674_v5, %v2361_v13  ;;  %1462 = vmatprep.subr.mxu1 %v1722_v8  ;;  %1494 = vmatprep.mubr.msk.f32.mxu1 %vm1723_vm1, %v1722_v8 }
 0x2aa   :  { %v1678_v18 = vpop.eup %1677  ;;  %1036 = vadd.xlane.f32.xlu1 %v1035_v53  ;;  %1057 = vadd.xlane.f32.xlu0 %v1056_v61  ;;  %v985_v56 = vmul.f32 %v1676_v11, %v2440_v6  ;;  %1689 = vrcp.f32 %v943_v30  ;;  %v1074_v11 = vld [vmem:[%s2692_s2 + $0x78] sm:$0xff] }
 0x2ab   :  { %v1680_v55 = vpop.eup %1679  ;;  %v940_v34 = vadd.f32 1.0, %v1678_v18  ;;  %v1038_v10 = vsel %vm72_vm0, %v1004_v60, 0.0  ;;  %v1072_v18 = vld [vmem:[%s2692_s2 + $0x68] sm:$0xff]  ;;  %v1097_v60 = vld [vmem:[%s2693_s3 + $0x20] sm:$0xff] }
 0x2ac   :  { %v1682_v26 = vpop.eup %1681  ;;  %v1008_v15 = vmul.f32 %v2450_v43, %v985_v56  ;;  %v942_v7 = vadd.f32 1.0, %v1680_v55 }
 0x2ad   :  { %v978_v52 = vmul.f32 %v1682_v26, %v2454_v29  ;;  %1691 = vrcp.f32 %v940_v34  ;;  %v1002_v29 = vmul.f32 %v2450_v43, %v979_v54  ;;  %v1099_v34 = vld [vmem:[%s2693_s3 + $0x30] sm:$0xff]  ;;  %v1066_v26 = vld [vmem:[%s2692_s2 + $0x38] sm:$0xff] }
 0x2ae   :  { %v1050_v37 = vsel %vm72_vm0, %v1008_v15, 0.0  ;;  %1693 = vrcp.f32 %v942_v7  ;;  %v1098_v7 = vld [vmem:[%s2693_s3 + $0x28] sm:$0xff] }
 0x2af   :  { %v1684_v6 = vpop.eup %1683  ;;  %1051 = vadd.xlane.f32.xlu0 %v1050_v37  ;;  %v1001_v62 = vmul.f32 %v2450_v43, %v978_v52  ;;  %v1032_v28 = vsel %vm72_vm0, %v1002_v29, 0.0  ;;  %v1069_v37 = vld [vmem:[%s2692_s2 + $0x50] sm:$0xff] }
 0x2b0   :  { %v1686_v9 = vpop.eup %1685  ;;  %v977_v33 = vmul.f32 %v1684_v6, %v2462_v44  ;;  %v1067_v6 = vld [vmem:[%s2692_s2 + $0x40] sm:$0xff] }
 0x2b1   :  { %v1029_v14 = vsel %vm72_vm0, %v1001_v62, 0.0  ;;  %v941_v1 = vadd.f32 1.0, %v1686_v9  ;;  %v1096_v9 = vld [vmem:[%s2693_s3 + $0x18] sm:$0xff] }
 0x2b2   :  { %1030 = vadd.xlane.f32.xlu1 %v1029_v14  ;;  %v1000_v0 = vmul.f32 %v2450_v43, %v977_v33  ;;  %v1068_v33 = vld [vmem:[%s2692_s2 + $0x48] sm:$0xff] }
 0x2b3   :  { %v1688_v59 = vpop.eup %1687  ;;  %1039 = vadd.xlane.f32.xlu0 %v1038_v10  ;;  %1695 = vrcp.f32 %v941_v1  ;;  %v1070_v1 = vld [vmem:[%s2692_s2 + $0x58] sm:$0xff]  ;;  %v1095_v10 = vld [vmem:[%s2693_s3 + $0x10] sm:$0xff] }
 0x2b4   :  { %v976_v13 = vmul.f32 %v1688_v59, %v2472_v41  ;;  %v1026_v44 = vsel %vm72_vm0, %v1000_v0, 0.0  ;;  %v1094_v59 = vld [vmem:[%s2693_s3 + $0x8] sm:$0xff] }
 0x2b6   :  { %v999_v39 = vmul.f32 %v2450_v43, %v976_v13 }
 0x2b7   :  { %v1690_v16 = vpop.eup %1689  ;;  %1033 = vadd.xlane.f32.xlu0 %v1032_v28  ;;  %v1065_v28 = vld [vmem:[%s2692_s2 + $0x30] sm:$0xff] }
 0x2b8   :  { %v1023_v31 = vsel %vm72_vm0, %v999_v39, 0.0  ;;  %v975_v46 = vmul.f32 %v1690_v16, %v2481_v21  ;;  %v1093_v39 = vld [vmem:[%s2693_s3] sm:$0xff] }
 0x2b9   :  { %1024 = vadd.xlane.f32.xlu1 %v1023_v31  ;;  %v1064_v31 = vld [vmem:[%s2692_s2 + $0x28] sm:$0xff] }
 0x2ba   :  { %v1692_v63 = vpop.eup %1691  ;;  %v998_v20 = vmul.f32 %v2450_v43, %v975_v46 }
 0x2bb   :  { %v1694_v40 = vpop.eup %1693  ;;  %1027 = vadd.xlane.f32.xlu0 %v1026_v44  ;;  %v972_v22 = vmul.f32 %v1692_v63, %v2489_v50  ;;  %v1107_v50 = vld [vmem:[%s2693_s3 + $0x70] sm:$0xff]  ;;  %v1063_v44 = vld [vmem:[%s2692_s2 + $0x20] sm:$0xff] }
 0x2bc   :  { %v1020_v41 = vsel %vm72_vm0, %v998_v20, 0.0  ;;  %v974_v24 = vmul.f32 %v1694_v40, %v2493_v42 }
 0x2bd   :  { %v995_v4 = vmul.f32 %v2450_v43, %v972_v22 }
 0x2be   :  { %v997_v36 = vmul.f32 %v2450_v43, %v974_v24 }
 0x2bf   :  { %1021 = vadd.xlane.f32.xlu0 %v1020_v41  ;;  %v1011_v47 = vsel %vm72_vm0, %v995_v4, 0.0  ;;  %v1062_v41 = vld [vmem:[%s2692_s2 + $0x18] sm:$0xff]  ;;  %v1060_v4 = vld [vmem:[%s2692_s2 + $0x8] sm:$0xff] }
 0x2c0   :  { %v1696_v17 = vpop.eup %1695  ;;  %v1017_v21 = vsel %vm72_vm0, %v997_v36, 0.0  ;;  %v1061_v36 = vld [vmem:[%s2692_s2 + $0x10] sm:$0xff] }
 0x2c1   :  { %1018 = vadd.xlane.f32.xlu1 %v1017_v21  ;;  %v973_v57 = vmul.f32 %v1696_v17, %v2502_v23  ;;  %v1108_v23 = vld [vmem:[%s2693_s3 + $0x78] sm:$0xff] }
 0x2c3   :  { %v996_v48 = vmul.f32 %v2450_v43, %v973_v57  ;;  %v1105_v43 = vld [vmem:[%s2693_s3 + $0x60] sm:$0xff] }
 0x2c5   :  { %1012 = vadd.xlane.f32.xlu1 %v1011_v47  ;;  %v1014_v42 = vsel %vm72_vm0, %v996_v48, 0.0  ;;  %v1059_v47 = vld [vmem:[%s2692_s2] sm:$0xff] }
 0x2c6   :  { %1015 = vadd.xlane.f32.xlu0 %v1014_v42 }
 0x2d6   :  { %1152 = vperm.xlu1 %1502, %v1107_v50  }
 0x2da   :  { %1149 = vperm.xlu1 %1502, %v1106_v27  }
 0x2dc   :  { %1155 = vperm.xlu0 %1501, %v1108_v23  }
 0x2de   :  { %1146 = vperm.xlu1 %1502, %v1105_v43  }
 0x2e2   :  { %1143 = vperm.xlu1 %1502, %v1104_v35  }
 0x2e6   :  { %1140 = vperm.xlu1 %1502, %v1103_v12  }
 0x2ea   :  { %1137 = vperm.xlu1 %1502, %v1102_v32  }
 0x2ee   :  { %1134 = vperm.xlu1 %1502, %v1101_v2  }
 0x2f2   :  { %1131 = vperm.xlu1 %1502, %v1100_v3  }
 0x315   :  { %v1043_v51 = vpop.xlane.xlu1 %1042 }
 0x316   :  { %v1085_v54 = vmul.f32 %v1069_v37, %v1043_v51  ;;  %v1091_v51 = vlaneseq }
 0x31d   :  { %v1046_v25 = vpop.xlane.xlu0 %1045 }
 0x31e   :  { %v1086_v29 = vmul.f32 %v1070_v1, %v1046_v25  ;;  %v1413_v1 = vld [vmem:[%s2696_s6] ss:$0 sm:$0xff]  ;;  %s1699_s6 = scalar_lea.vmem %s1374_s11, 128 }
 0x31f   :  { %1697 = vrcp.f32 %v1413_v1  ;;  %p1700_p0 = scmp.ne.s32.totalorder %s1374_s11, %s1699_s6  ;;  %p1705_p2 = scmp.lt.s32.totalorder %s1699_s6, %s1699_s6 }
 0x321   :  { %p1706_p3 = por %p1705_p2, %p1704_p1 }
 0x323   :  { %p1707_p4 = pnand %p1706_p3, %p1700_p0 }
 0x327   :  { %v1055_v45 = vpop.xlane.xlu1 %1054 }
 0x328   :  { %v1089_v19 = vmul.f32 %v1073_v38, %v1055_v45 }
 0x32a   :  { %1245 = vperm.xlu1 %1502, %v1089_v19   ;;  %v2642_v19 = vand.u32 127, %v1091_v51 }
 0x32f   :  { %v1049_v5 = vpop.xlane.xlu1 %1048 }
 0x330   :  { %v1087_v30 = vmul.f32 %v1071_v49, %v1049_v5 }
 0x332   :  { %1235 = vperm.xlu1 %1502, %v1087_v30  }
 0x333   :  { %v1058_v53 = vpop.xlane.xlu0 %1057  ;;  %v1037_v62 = vpop.xlane.xlu1 %1036 }
 0x334   :  { %v1090_v61 = vmul.f32 %v1074_v11, %v1058_v53  ;;  %v1083_v14 = vmul.f32 %v1067_v6, %v1037_v62 }
 0x336   :  { %1250 = vperm.xlu1 %1502, %v1090_v61  }
 0x338   :  { %v1052_v56 = vpop.xlane.xlu0 %1051 }
 0x339   :  { %v1088_v58 = vmul.f32 %v1072_v18, %v1052_v56 }
 0x33b   :  { %1240 = vperm.xlu1 %1502, %v1088_v58   ;;  %v1031_v0 = vpop.xlane.xlu1 %1030 }
 0x33c   :  { %v1040_v55 = vpop.xlane.xlu0 %1039  ;;  %v1081_v16 = vmul.f32 %v1065_v28, %v1031_v0 }
 0x33d   :  { %v1084_v13 = vmul.f32 %v1068_v33, %v1040_v55 }
 0x33f   :  { %1128 = vperm.xlu1 %1502, %v1099_v34  }
 0x340   :  { %v1034_v15 = vpop.xlane.xlu0 %1033 }
 0x341   :  { %v1082_v52 = vmul.f32 %v1066_v26, %v1034_v15 }
 0x342   :  { %v1025_v20 = vpop.xlane.xlu1 %1024 }
 0x343   :  { %1125 = vperm.xlu1 %1502, %v1098_v7   ;;  %1210 = vperm.xlu0 %1501, %v1082_v52   ;;  %v1079_v40 = vmul.f32 %v1063_v44, %v1025_v20 }
 0x344   :  { %v1028_v46 = vpop.xlane.xlu0 %1027 }
 0x345   :  { %v1080_v63 = vmul.f32 %v1064_v31, %v1028_v46 }
 0x347   :  { %1122 = vperm.xlu1 %1502, %v1097_v60   ;;  %1225 = vperm.xlu0 %1501, %v1085_v54  }
 0x348   :  { %v1022_v24 = vpop.xlane.xlu0 %1021 }
 0x349   :  { %v1078_v22 = vmul.f32 %v1062_v41, %v1022_v24 }
 0x34a   :  { %v1019_v17 = vpop.xlane.xlu1 %1018 }
 0x34b   :  { %1119 = vperm.xlu1 %1502, %v1096_v9   ;;  %1215 = vperm.xlu0 %1501, %v1083_v14   ;;  %v1077_v21 = vmul.f32 %v1061_v36, %v1019_v17  ;;  %v1270_v9 = vld [vmem:[%s2691_s1] sm:$0xff] }
 0x34e   :  { %v1013_v42 = vpop.xlane.xlu1 %1012 }
 0x34f   :  { %1116 = vperm.xlu1 %1502, %v1095_v10   ;;  %1230 = vperm.xlu0 %1501, %v1086_v29   ;;  %v1016_v57 = vpop.xlane.xlu0 %1015  ;;  %v1075_v50 = vmul.f32 %v1059_v47, %v1013_v42  ;;  %v1698_v10 = vpop.eup %1697 }
 0x350   :  { %v1076_v48 = vmul.f32 %v1060_v4, %v1016_v57 }
 0x352   :  { %v1153_v27 = vpop.permute.xlu1 %1152 }
 0x353   :  { %1113 = vperm.xlu1 %1502, %v1094_v59   ;;  %1220 = vperm.xlu0 %1501, %v1084_v13   ;;  %vm1171_vm3 = vcmp.eq.s32.totalorder %v2642_v19, %v1153_v27  ;;  %v1414_v13 = vld [vmem:[%s2695_s5] ss:$0 sm:$0xff] }
 0x356   :  { %v1150_v23 = vpop.permute.xlu1 %1149 }
 0x357   :  { %1110 = vperm.xlu1 %1502, %v1093_v39   ;;  %1205 = vperm.xlu0 %1501, %v1081_v16   ;;  %v1156_v45 = vpop.permute.xlu0 %1155  ;;  %vm1170_vm4 = vcmp.eq.s32.totalorder %v2642_v19, %v1150_v23 }
 0x358   :  { %vm1172_vm2 = vcmp.eq.s32.totalorder %v2642_v19, %v1156_v45 }
 0x35a   :  { %v1147_v43 = vpop.permute.xlu1 %1146 }
 0x35b   :  { %1200 = vperm.xlu0 %1501, %v1080_v63   ;;  %vm1169_vm5 = vcmp.eq.s32.totalorder %v2642_v19, %v1147_v43 }
 0x35e   :  { %v1144_v35 = vpop.permute.xlu1 %1143 }
 0x35f   :  { %1195 = vperm.xlu0 %1501, %v1079_v40   ;;  %vm1168_vm6 = vcmp.eq.s32.totalorder %v2642_v19, %v1144_v35 }
 0x362   :  { %v1141_v12 = vpop.permute.xlu1 %1140 }
 0x363   :  { %1190 = vperm.xlu0 %1501, %v1078_v22   ;;  %vm1167_vm7 = vcmp.eq.s32.totalorder %v2642_v19, %v1141_v12 }
 0x366   :  { %v1138_v32 = vpop.permute.xlu1 %1137 }
 0x367   :  { %1185 = vperm.xlu0 %1501, %v1077_v21   ;;  %vm1166_vm8 = vcmp.eq.s32.totalorder %v2642_v19, %v1138_v32 }
 0x36a   :  { %v1135_v2 = vpop.permute.xlu1 %1134 }
 0x36b   :  { %1180 = vperm.xlu0 %1501, %v1076_v48   ;;  %vm1165_vm9 = vcmp.eq.s32.totalorder %v2642_v19, %v1135_v2 }
 0x36e   :  { %v1132_v3 = vpop.permute.xlu1 %1131 }
 0x36f   :  { %1175 = vperm.xlu0 %1501, %v1075_v50   ;;  %vm1164_vm10 = vcmp.eq.s32.totalorder %v2642_v19, %v1132_v3 }
 0x3a5   :  { %v1246_v38 = vpop.permute.xlu1 %1245 }
 0x3ad   :  { %v1236_v49 = vpop.permute.xlu1 %1235 }
 0x3b1   :  { %v1251_v25 = vpop.permute.xlu1 %1250 }
 0x3b2   :  { %1463 = vmatpush3.msk.msra.mxu1 %vm1172_vm2, %v1251_v25 }
 0x3b3   :  { %1464 = vmatprep.subr.mxu1 %v1722_v8 }
 0x3b4   :  { %1465 = vmatpush3.msk.msra.mxu1 %vm1171_vm3, %v1246_v38 }
 0x3b5   :  { %1466 = vmatprep.subr.mxu1 %v1722_v8 }
 0x3b6   :  { %v1241_v5 = vpop.permute.xlu1 %1240 }
 0x3b7   :  { %1467 = vmatpush3.msk.msra.mxu1 %vm1170_vm4, %v1241_v5 }
 0x3b8   :  { %1468 = vmatprep.subr.mxu1 %v1722_v8 }
 0x3b9   :  { %1469 = vmatpush3.msk.msra.mxu1 %vm1169_vm5, %v1236_v49 }
 0x3ba   :  { %1470 = vmatprep.subr.mxu1 %v1722_v8  ;;  %v1129_v53 = vpop.permute.xlu1 %1128 }
 0x3bb   :  { %vm1163_vm11 = vcmp.eq.s32.totalorder %v2642_v19, %v1129_v53 }
 0x3be   :  { %v1211_v30 = vpop.permute.xlu0 %1210  ;;  %v1126_v18 = vpop.permute.xlu1 %1125 }
 0x3bf   :  { %vm1162_vm12 = vcmp.eq.s32.totalorder %v2642_v19, %v1126_v18 }
 0x3c2   :  { %v1226_v11 = vpop.permute.xlu0 %1225  ;;  %v1123_v55 = vpop.permute.xlu1 %1122 }
 0x3c3   :  { %vm1161_vm13 = vcmp.eq.s32.totalorder %v2642_v19, %v1123_v55 }
 0x3c6   :  { %v1216_v61 = vpop.permute.xlu0 %1215  ;;  %v1120_v26 = vpop.permute.xlu1 %1119 }
 0x3c7   :  { %vm1160_vm14 = vcmp.eq.s32.totalorder %v2642_v19, %v1120_v26 }
 0x3ca   :  { %v1231_v56 = vpop.permute.xlu0 %1230  ;;  %v1117_v52 = vpop.permute.xlu1 %1116 }
 0x3cb   :  { %1471 = vmatpush3.msk.msra.mxu1 %vm1168_vm6, %v1231_v56  ;;  %vm1159_vm15 = vcmp.eq.s32.totalorder %v2642_v19, %v1117_v52 }
 0x3cc   :  { %1472 = vmatprep.subr.mxu1 %v1722_v8 }
 0x3cd   :  { %1473 = vmatpush3.msk.msra.mxu1 %vm1167_vm7, %v1226_v11 }
 0x3ce   :  { %1474 = vmatprep.subr.mxu1 %v1722_v8  ;;  %v1221_v58 = vpop.permute.xlu0 %1220  ;;  %v1114_v60 = vpop.permute.xlu1 %1113 }
 0x3cf   :  { %1475 = vmatpush3.msk.msra.mxu1 %vm1166_vm8, %v1221_v58  ;;  %vm1158_vm0 = vcmp.eq.s32.totalorder %v2642_v19, %v1114_v60 }
 0x3d0   :  { %1476 = vmatprep.subr.mxu1 %v1722_v8 }
 0x3d1   :  { %1477 = vmatpush3.msk.msra.mxu1 %vm1165_vm9, %v1216_v61 }
 0x3d2   :  { %1478 = vmatprep.subr.mxu1 %v1722_v8  ;;  %v1206_v34 = vpop.permute.xlu0 %1205  ;;  %v1111_v62 = vpop.permute.xlu1 %1110 }
 0x3d3   :  { %1479 = vmatpush3.msk.msra.mxu1 %vm1164_vm10, %v1211_v30  ;;  %vm1157_vm1 = vcmp.eq.s32.totalorder %v2642_v19, %v1111_v62 }
 0x3d4   :  { %1480 = vmatprep.subr.mxu1 %v1722_v8 }
 0x3d5   :  { %1481 = vmatpush3.msk.msra.mxu1 %vm1163_vm11, %v1206_v34 }
 0x3d6   :  { %1482 = vmatprep.subr.mxu1 %v1722_v8  ;;  %v1201_v15 = vpop.permute.xlu0 %1200 }
 0x3d7   :  { %1483 = vmatpush3.msk.msra.mxu1 %vm1162_vm12, %v1201_v15 }
 0x3d8   :  { %1484 = vmatprep.subr.mxu1 %v1722_v8 }
 0x3da   :  { %v1196_v7 = vpop.permute.xlu0 %1195 }
 0x3db   :  { %1485 = vmatpush3.msk.msra.mxu1 %vm1161_vm13, %v1196_v7 }
 0x3dc   :  { %1486 = vmatprep.subr.mxu1 %v1722_v8 }
 0x3de   :  { %v1191_v37 = vpop.permute.xlu0 %1190 }
 0x3df   :  { %1487 = vmatpush3.msk.msra.mxu1 %vm1160_vm14, %v1191_v37 }
 0x3e0   :  { %1488 = vmatprep.subr.mxu1 %v1722_v8 }
 0x3e2   :  { %v1186_v54 = vpop.permute.xlu0 %1185 }
 0x3e3   :  { %1489 = vmatpush3.msk.msra.mxu1 %vm1159_vm15, %v1186_v54 }
 0x3e4   :  { %1490 = vmatprep.subr.mxu1 %v1722_v8 }
 0x3e6   :  { %v1181_v6 = vpop.permute.xlu0 %1180 }
 0x3e7   :  { %1491 = vmatpush3.msk.msra.mxu1 %vm1158_vm0, %v1181_v6 }
 0x3e8   :  { %1492 = vmatprep.subr.mxu1 %v1722_v8  ;;  %v1356_v8 = vld [vmem:[%s2694_s4] sm:$0xff] }
 0x3ea   :  { %v1176_v14 = vpop.permute.xlu0 %1175 }
 0x3eb   :  { %1493 = vmatpush3.msk.msra.mxu1 %vm1157_vm1, %v1176_v14 }
 0x3ec   :  { %1495 = vmatmul.mubr.f32.vlgmr.msra.gmra.mxu1 %v1270_v9 }
 0x4ac   :  { %v1337_v29 = vpop.f32.mrf.mxu1 }
 0x4ad   :  { %v1355_v33 = vmul.f32 %v1698_v10, %v1337_v29 }
 0x4ae   :  { %v1496_v59 = vpop.f32.mrf.mxu1 }
 0x4af   :  { %v1357_v28 = vadd.f32 %v1356_v8, %v1355_v33 }
 0x4b1   :  { %v1365_v0 = vmul.f32 %v1414_v13, %v1357_v28 }
 0x4b3   :  { %1366 = vst [vmem:[#allocation3] sm:$0xff] %v1365_v0 }
 0x4b4   :  { %1710 = shalt.err (!%p1707_p4)
}
 0x4b5   :  { %1376 = dma.vmem_to_hbm [thread:$0]  %s1374_s11, 128, %s2704_s14, [#allocation4]  }
 0x4b6   :  { %1719 = dma.done.wait [#allocation4], 128  }
 0x4b7   :  { %1720 = vsyncadd [#allocation4], 4294967168 }
 0x4b8   :  { %1380 = vsyncpa [#allocation4], 1 }

</bundles_post_ra>
